<compile_context>
chip_gen: v5e
topology: v5e:2x2
jax: 0.10.0
libtpu: 0.0.40
codegen_flags: <defaults>
</compile_context>

<pallas_src>
import functools

import jax
import jax.numpy as jnp
from jax.experimental import pallas as pl
from jax.experimental.pallas import tpu as pltpu


def _round_up(x, m):
    return (x + m - 1) // m * m


def _sigmoid(x):
    # hand-rolled to guarantee a clean Mosaic lowering (exp + divide on EUP/VPU)
    return 1.0 / (1.0 + jnp.exp(-x))


# ---------------------------------------------------------------------------
# Conv1DBlock x3 : one fused Pallas kernel
# ---------------------------------------------------------------------------
def _conv_layer(x, w_ref, b_ref, scale_ref, shift_ref, *, T, K, compute_dtype):
    """One Conv1DBlock on a (channels, B*T)-flattened slab, fully in VMEM.

    x          : (F_in_pad, BT_pad) activations (valid data in [:, :B*T])
    w_ref      : (F_out_pad, K*F_in_pad) conv weight, tap-major, compute_dtype
    b_ref      : (F_out_pad, 1) conv bias (f32)
    scale_ref  : (F_out_pad, 1) folded BN scale = gamma / sqrt(var + eps)
    shift_ref  : (F_out_pad, 1) folded BN shift = beta - mean * scale
    returns    : (F_out_pad, BT_pad) f32
    """
    f_in_pad, bt_pad = x.shape
    pad = K // 2
    xc = x.astype(compute_dtype)

    # position within each length-T sequence, for every flattened lane
    t_local = jax.lax.broadcasted_iota(jnp.int32, (1, bt_pad), 1) % T

    # Build the K lane-shifted copies once and stack them -> one big-contraction
    # matmul instead of K thin ones ("same" conv padding is done by the masks,
    # no host-side jnp.pad / no extra HBM pass).
    parts = []
    for k in range(K):
        s = k - pad  # output position t reads input position t + s
        if s == 0:
            shifted = xc
        elif s > 0:
            shifted = jnp.concatenate(
                [xc[:, s:], jnp.zeros((f_in_pad, s), compute_dtype)], axis=1)
        else:
            shifted = jnp.concatenate(
                [jnp.zeros((f_in_pad, -s), compute_dtype), xc[:, :s]], axis=1)
        # zero taps that would cross a batch-element boundary (zero "same" pad)
        valid = (t_local >= -s) & (t_local < T - s)
        parts.append(jnp.where(valid, shifted, jnp.zeros_like(shifted)))
    stacked = jnp.concatenate(parts, axis=0)          # (K*F_in_pad, BT_pad)

    # conv (all K taps) as ONE MXU matmul, f32 accumulation
    y = jnp.dot(w_ref[...], stacked, preferred_element_type=jnp.float32)
    y = y + b_ref[...]                                # conv bias
    y = jnp.maximum(y, 0.0)                           # ReLU
    y = y * scale_ref[...] + shift_ref[...]           # BatchNorm1d (eval, folded)
    # dropout: identity in eval mode
    return y


def _conv_stack_kernel(x_ref,
                       w1_ref, b1_ref, sc1_ref, sh1_ref,
                       w2_ref, b2_ref, sc2_ref, sh2_ref,
                       w3_ref, b3_ref, sc3_ref, sh3_ref,
                       o_ref, *, T, K, compute_dtype):
    layer = functools.partial(_conv_layer, T=T, K=K, compute_dtype=compute_dtype)
    y = layer(x_ref[...], w1_ref, b1_ref, sc1_ref, sh1_ref)
    y = layer(y, w2_ref, b2_ref, sc2_ref, sh2_ref)
    y = layer(y, w3_ref, b3_ref, sc3_ref, sh3_ref)
    o_ref[...] = y.astype(o_ref.dtype)


def _prep_conv_layer(w, b, gamma, beta, mean, var, eps, compute_dtype):
    """Pad channels to sublane multiples, fold BN, reshape weight tap-major."""
    f_out, f_in, k = w.shape
    f_out_p, f_in_p = _round_up(f_out, 8), _round_up(f_in, 8)
    w_p = jnp.zeros((f_out_p, f_in_p, k), jnp.float32).at[:f_out, :f_in, :].set(w)
    # row block kk of the stacked operand holds tap kk  ->  (F_out_p, K*F_in_p)
    w2 = jnp.transpose(w_p, (0, 2, 1)).reshape(f_out_p, k * f_in_p)
    scale = gamma / jnp.sqrt(var + eps)
    shift = beta - mean * scale

    def colpad(v):  # (F_out,) -> (F_out_p, 1); pad channels get 0 -> stay zero
        return jnp.zeros((f_out_p, 1), jnp.float32).at[:f_out, 0].set(v)

    return (w2.astype(compute_dtype), colpad(b), colpad(scale), colpad(shift))


def conv_stack_forward(x, layers, *, T, eps=1e-5, compute_dtype=jnp.bfloat16):
    """x: (F0, B*T) f32 channels-first with B*T flattened on the lane axis.
    layers: list of dicts (w, b, gamma, beta, mean, var).  Returns (F_last, B*T) f32."""
    f0, bt = x.shape
    k = layers[0]["w"].shape[-1]
    f0_p = _round_up(f0, 8)
    bt_p = _round_up(bt, 128)   # lane-dense tiles -> unmasked vst
    x_p = jnp.zeros((f0_p, bt_p), compute_dtype).at[:f0, :bt].set(
        x.astype(compute_dtype))

    prepped = [
        _prep_conv_layer(l["w"], l["b"], l["gamma"], l["beta"], l["mean"],
                         l["var"], eps, compute_dtype) for l in layers
    ]
    f_last = layers[-1]["w"].shape[0]
    f_last_p = _round_up(f_last, 8)

    flat_args = [x_p]
    in_specs = [pl.BlockSpec(x_p.shape, lambda i: (0, 0))]
    for (w2, b, sc, sh) in prepped:
        for a in (w2, b, sc, sh):
            flat_args.append(a)
            in_specs.append(pl.BlockSpec(a.shape, lambda i: (0, 0)))

    kernel = functools.partial(_conv_stack_kernel, T=T, K=k,
                               compute_dtype=compute_dtype)
    out = pl.pallas_call(
        kernel,
        grid=(1,),
        in_specs=in_specs,
        out_specs=pl.BlockSpec((f_last_p, bt_p), lambda i: (0, 0)),
        out_shape=jax.ShapeDtypeStruct((f_last_p, bt_p), jnp.float32),
        compiler_params=pltpu.CompilerParams(
            dimension_semantics=("parallel",)),
    )(*flat_args)
    return out[:f_last, :bt]


# ---------------------------------------------------------------------------
# Bidirectional LSTM (packed-sequence semantics via length masking)
# ---------------------------------------------------------------------------
def _bilstm_kernel(x_ref, lens_ref,
                   wih_f_ref, whh_f_ref, b_f_ref,
                   wih_b_ref, whh_b_ref, b_b_ref,
                   of_ref, ob_ref, *, T, H):
    b_sz = of_ref.shape[1]
    lens = lens_ref[...]                          # (B, 1) int32

    def cell(x_t, h, c, wih_ref, whh_ref, b_ref):
        g = (jnp.dot(x_t, wih_ref[...], preferred_element_type=jnp.float32)
             + jnp.dot(h, whh_ref[...], preferred_element_type=jnp.float32)
             + b_ref[...])                        # (B, 4H), torch gate order i,f,g,o
        i_g = _sigmoid(g[:, 0 * H:1 * H])
        f_g = _sigmoid(g[:, 1 * H:2 * H])
        g_g = jnp.tanh(g[:, 2 * H:3 * H])
        o_g = _sigmoid(g[:, 3 * H:4 * H])
        c_new = f_g * c + i_g * g_g
        h_new = o_g * jnp.tanh(c_new)
        return h_new, c_new

    def step(i, carry):
        h_f, c_f, h_b, c_b = carry
        # ---- forward direction, time step i ----
        h_f, c_f = cell(x_ref[i], h_f, c_f, wih_f_ref, whh_f_ref, b_f_ref)
        of_ref[i] = jnp.where(i < lens, h_f, 0.0)       # zeros past length
        # ---- backward direction, time step T-1-i ----
        t_r = T - 1 - i
        h_new, c_new = cell(x_ref[t_r], h_b, c_b, wih_b_ref, whh_b_ref, b_b_ref)
        valid = t_r < lens                              # (B, 1)
        h_b = jnp.where(valid, h_new, h_b)              # don't step past length
        c_b = jnp.where(valid, c_new, c_b)
        ob_ref[t_r] = jnp.where(valid, h_b, 0.0)
        return h_f, c_f, h_b, c_b

    zeros = jnp.zeros((b_sz, H), jnp.float32)
    jax.lax.fori_loop(0, T, step, (zeros, zeros, zeros, zeros))


def bilstm_forward(x, lens, p):
    """x: (B, T, F) f32, lens: (B,) int -> (B, T, 2H) f32, zeros past each length."""
    b_sz, t_len, _ = x.shape
    h = p["whh_f"].shape[1]
    x_tbf = jnp.transpose(x, (1, 0, 2))                 # (T, B, F)
    lens2 = lens.reshape(b_sz, 1).astype(jnp.int32)

    def prep(wih, whh, bih, bhh):                       # torch layout -> kernel layout
        return (jnp.transpose(wih).astype(jnp.float32),     # (F, 4H)
                jnp.transpose(whh).astype(jnp.float32),     # (H, 4H)
                (bih + bhh).reshape(1, 4 * h).astype(jnp.float32))

    wih_f, whh_f, b_f = prep(p["wih_f"], p["whh_f"], p["bih_f"], p["bhh_f"])
    wih_b, whh_b, b_b = prep(p["wih_b"], p["whh_b"], p["bih_b"], p["bhh_b"])

    args = (x_tbf, lens2, wih_f, whh_f, b_f, wih_b, whh_b, b_b)
    in_specs = [
        pl.BlockSpec(x_tbf.shape, lambda i: (0, 0, 0)),
        pl.BlockSpec(lens2.shape, lambda i: (0, 0)),
        pl.BlockSpec(wih_f.shape, lambda i: (0, 0)),
        pl.BlockSpec(whh_f.shape, lambda i: (0, 0)),
        pl.BlockSpec(b_f.shape, lambda i: (0, 0)),
        pl.BlockSpec(wih_b.shape, lambda i: (0, 0)),
        pl.BlockSpec(whh_b.shape, lambda i: (0, 0)),
        pl.BlockSpec(b_b.shape, lambda i: (0, 0)),
    ]
    out_shape = (jax.ShapeDtypeStruct((t_len, b_sz, h), jnp.float32),
                 jax.ShapeDtypeStruct((t_len, b_sz, h), jnp.float32))
    out_specs = (pl.BlockSpec((t_len, b_sz, h), lambda i: (0, 0, 0)),
                 pl.BlockSpec((t_len, b_sz, h), lambda i: (0, 0, 0)))

    kernel = functools.partial(_bilstm_kernel, T=t_len, H=h)
    of, ob = pl.pallas_call(
        kernel,
        grid=(1,),
        in_specs=in_specs,
        out_specs=out_specs,
        out_shape=out_shape,
        compiler_params=pltpu.CompilerParams(
            dimension_semantics=("arbitrary",)),   # sequential recurrence inside
    )(*args)
    out = jnp.concatenate([of, ob], axis=-1)            # (T, B, 2H)
    return jnp.transpose(out, (1, 0, 2))                # (B, T, 2H)


# ---------------------------------------------------------------------------
# Full NarTacoEncoder forward
# ---------------------------------------------------------------------------
def nar_taco_encoder_forward(labels, lens, params, *, compute_dtype=jnp.bfloat16):
    """labels: (B, N) int32, lens: (B,) int32 -> (B, N, 2*lstm_size) f32."""
    b_sz, n = labels.shape
    # nn.Embedding gather + layout transposes: pure data movement, kept as XLA glue.
    emb = params["embedding"][labels]                   # (B, N, E)
    x = jnp.transpose(emb.reshape(b_sz * n, -1))        # (E, B*N) channels-first
    conv_out = conv_stack_forward(x, params["convs"], T=n,
                                  compute_dtype=compute_dtype)   # (F, B*N)
    f = conv_out.shape[0]
    blstm_in = jnp.transpose(conv_out.reshape(f, b_sz, n), (1, 2, 0))  # (B, N, F)
    return bilstm_forward(blstm_in, lens, params["lstm"])


# ---------------------------------------------------------------------------
# Pure-JAX reference (models the same eval-mode forward, incl. bf16 conv inputs)
# ---------------------------------------------------------------------------
def _lstm_dir_ref(x, lens, wih, whh, b, reverse):
    hp = jax.lax.Precision.HIGHEST
    b_sz, t_len, _ = x.shape
    h_dim = whh.shape[1]
    h = jnp.zeros((b_sz, h_dim), jnp.float32)
    c = jnp.zeros((b_sz, h_dim), jnp.float32)
    outs = [None] * t_len
    order = range(t_len - 1, -1, -1) if reverse else range(t_len)
    for t in order:
        g = (jnp.dot(x[:, t, :], wih.T, precision=hp)
             + jnp.dot(h, whh.T, precision=hp) + b)
        i_g = _sigmoid(g[:, :h_dim])
        f_g = _sigmoid(g[:, h_dim:2 * h_dim])
        g_g = jnp.tanh(g[:, 2 * h_dim:3 * h_dim])
        o_g = _sigmoid(g[:, 3 * h_dim:])
        c_new = f_g * c + i_g * g_g
        h_new = o_g * jnp.tanh(c_new)
        valid = (t < lens)[:, None]
        if reverse:
            h = jnp.where(valid, h_new, h)
            c = jnp.where(valid, c_new, c)
            outs[t] = jnp.where(valid, h, 0.0)
        else:
            outs[t] = jnp.where(valid, h_new, 0.0)
            h, c = h_new, c_new
    return jnp.stack(outs, axis=1)                      # (B, T, H)


def _reference_forward(labels, lens, params, *, compute_dtype=jnp.bfloat16,
                       eps=1e-5):
    hp = jax.lax.Precision.HIGHEST
    x = params["embedding"][labels]                     # (B, N, E)
    x = jnp.transpose(x, (0, 2, 1))                     # (B, E, N)
    for l in params["convs"]:
        k = l["w"].shape[-1]
        pad = k // 2
        # model the kernel's bf16 matmul inputs + f32 accumulation exactly
        xin = x.astype(compute_dtype).astype(jnp.float32)
        w = l["w"].astype(compute_dtype).astype(jnp.float32)
        y = jax.lax.conv_general_dilated(
            xin, w, window_strides=(1,), padding=((pad, pad),),
            dimension_numbers=("NCH", "OIH", "NCH"), precision=hp)
        y = y + l["b"][None, :, None]
        y = jnp.maximum(y, 0.0)
        scale = l["gamma"] / jnp.sqrt(l["var"] + eps)
        shift = l["beta"] - l["mean"] * scale
        x = y * scale[None, :, None] + shift[None, :, None]
    x = jnp.transpose(x, (0, 2, 1))                     # (B, N, F)
    lp = params["lstm"]
    out_f = _lstm_dir_ref(x, lens, lp["wih_f"], lp["whh_f"],
                          lp["bih_f"] + lp["bhh_f"], reverse=False)
    out_b = _lstm_dir_ref(x, lens, lp["wih_b"], lp["whh_b"],
                          lp["bih_b"] + lp["bhh_b"], reverse=True)
    return jnp.concatenate([out_f, out_b], axis=-1)


if __name__ == "__main__":
    # Small NarEncoderConfig-consistent shapes.
    B, N = 2, 16          # batch, label sequence length
    VOCAB = 40            # label_in_dim
    E = 12                # embedding_size (exercises sublane padding to 16)
    F_HID = 32            # conv_hidden_size
    K = 3                 # filter_size (odd, as the module asserts)
    H = 32                # lstm_size

    key = jax.random.PRNGKey(0)
    keys = iter(jax.random.split(key, 32))

    labels = jax.random.randint(next(keys), (B, N), 0, VOCAB)
    # max length == N so pad_packed_sequence output length equals N
    lens = jnp.array([N, 11], dtype=jnp.int32)

    emb_table = jax.random.normal(next(keys), (VOCAB, E), jnp.float32)

    def make_conv_layer(kin, kout):
        fan_in, fan_out = kin * K, kout * K
        std = (2.0 / (fan_in + fan_out)) ** 0.5          # xavier_normal_
        w = std * jax.random.normal(next(keys), (kout, kin, K), jnp.float32)
        bound = 1.0 / (kin * K) ** 0.5                   # torch conv bias default
        b = jax.random.uniform(next(keys), (kout,), jnp.float32, -bound, bound)
        # non-trivial BatchNorm eval statistics / affine params
        gamma = jax.random.uniform(next(keys), (kout,), jnp.float32, 0.8, 1.2)
        beta = 0.1 * jax.random.normal(next(keys), (kout,), jnp.float32)
        mean = 0.1 * jax.random.normal(next(keys), (kout,), jnp.float32)
        var = jax.random.uniform(next(keys), (kout,), jnp.float32, 0.5, 1.5)
        return dict(w=w, b=b, gamma=gamma, beta=beta, mean=mean, var=var)

    convs = [make_conv_layer(E, F_HID),
             make_conv_layer(F_HID, F_HID),
             make_conv_layer(F_HID, F_HID)]

    def make_lstm_dir():
        bound = 1.0 / H ** 0.5
        u = lambda s: jax.random.uniform(next(keys), s, jnp.float32, -bound, bound)
        return u((4 * H, F_HID)), u((4 * H, H)), u((4 * H,)), u((4 * H,))

    wih_f, whh_f, bih_f, bhh_f = make_lstm_dir()
    wih_b, whh_b, bih_b, bhh_b = make_lstm_dir()
    lstm = dict(wih_f=wih_f, whh_f=whh_f, bih_f=bih_f, bhh_f=bhh_f,
                wih_b=wih_b, whh_b=whh_b, bih_b=bih_b, bhh_b=bhh_b)

    params = dict(embedding=emb_table, convs=convs, lstm=lstm)

    out = jax.jit(nar_taco_encoder_forward)(labels, lens, params)
    out = jax.block_until_ready(out)
    assert out.shape == (B, N, 2 * H)

    ref = _reference_forward(labels, lens, params)
    # bf16 conv-matmul inputs (perf feedback for v6e/v7x MXU) -> mild tolerance
    err = jnp.max(jnp.abs(out - ref))
    assert jnp.allclose(out, ref, atol=2e-3, rtol=2e-3), f"max abs err {err}"
    # packed-sequence semantics: positions past each length are exactly zero
    assert jnp.all(out[1, int(lens[1]):, :] == 0.0)

    print("KERNEL_OK")
</pallas_src>

<mosaic_0001>
module attributes {stable_mosaic.version = 11 : i64} {
  func.func @_conv_stack_kernel(%arg0: i32, %arg1: memref<16x128xbf16, #tpu.memory_space<vmem>>, %arg2: memref<32x48xbf16, #tpu.memory_space<vmem>>, %arg3: memref<32x1xf32, #tpu.memory_space<vmem>>, %arg4: memref<32x1xf32, #tpu.memory_space<vmem>>, %arg5: memref<32x1xf32, #tpu.memory_space<vmem>>, %arg6: memref<32x96xbf16, #tpu.memory_space<vmem>>, %arg7: memref<32x1xf32, #tpu.memory_space<vmem>>, %arg8: memref<32x1xf32, #tpu.memory_space<vmem>>, %arg9: memref<32x1xf32, #tpu.memory_space<vmem>>, %arg10: memref<32x96xbf16, #tpu.memory_space<vmem>>, %arg11: memref<32x1xf32, #tpu.memory_space<vmem>>, %arg12: memref<32x1xf32, #tpu.memory_space<vmem>>, %arg13: memref<32x1xf32, #tpu.memory_space<vmem>>, %arg14: memref<32x128xf32, #tpu.memory_space<vmem>>) attributes {dimension_semantics = [#tpu.dimension_semantics<parallel>], iteration_bounds = array<i64: 1>, scalar_prefetch = 0 : i64, scratch_operands = 0 : i64, tpu.core_type = #tpu.core_type<tc>, window_params = [{pipeline_mode = #tpu.pipeline_mode<synchronous>, transform_indices = @transform_0, window_bounds = array<i64: 16, 128>}, {pipeline_mode = #tpu.pipeline_mode<synchronous>, transform_indices = @transform_1, window_bounds = array<i64: 32, 48>}, {pipeline_mode = #tpu.pipeline_mode<synchronous>, transform_indices = @transform_2, window_bounds = array<i64: 32, 1>}, {pipeline_mode = #tpu.pipeline_mode<synchronous>, transform_indices = @transform_3, window_bounds = array<i64: 32, 1>}, {pipeline_mode = #tpu.pipeline_mode<synchronous>, transform_indices = @transform_4, window_bounds = array<i64: 32, 1>}, {pipeline_mode = #tpu.pipeline_mode<synchronous>, transform_indices = @transform_5, window_bounds = array<i64: 32, 96>}, {pipeline_mode = #tpu.pipeline_mode<synchronous>, transform_indices = @transform_6, window_bounds = array<i64: 32, 1>}, {pipeline_mode = #tpu.pipeline_mode<synchronous>, transform_indices = @transform_7, window_bounds = array<i64: 32, 1>}, {pipeline_mode = #tpu.pipeline_mode<synchronous>, transform_indices = @transform_8, window_bounds = array<i64: 32, 1>}, {pipeline_mode = #tpu.pipeline_mode<synchronous>, transform_indices = @transform_9, window_bounds = array<i64: 32, 96>}, {pipeline_mode = #tpu.pipeline_mode<synchronous>, transform_indices = @transform_10, window_bounds = array<i64: 32, 1>}, {pipeline_mode = #tpu.pipeline_mode<synchronous>, transform_indices = @transform_11, window_bounds = array<i64: 32, 1>}, {pipeline_mode = #tpu.pipeline_mode<synchronous>, transform_indices = @transform_12, window_bounds = array<i64: 32, 1>}, {pipeline_mode = #tpu.pipeline_mode<synchronous>, transform_indices = @transform_13, window_bounds = array<i64: 32, 128>}]} {
    %c0 = arith.constant 0 : index
    %c0_0 = arith.constant 0 : index
    %0 = vector.load %arg1[%c0, %c0_0] : memref<16x128xbf16, #tpu.memory_space<vmem>>, vector<16x128xbf16>
    %1 = tpu.iota {dimensions = array<i32: 1>} : vector<1x128xi32>
    %c16_i32 = arith.constant 16 : i32
    %c0_i32 = arith.constant 0 : i32
    %2 = arith.cmpi eq, %c16_i32, %c0_i32 : i32
    %c1_i32 = arith.constant 1 : i32
    %3 = arith.select %2, %c1_i32, %c16_i32 : i32
    %4 = vector.broadcast %3 : i32 to vector<1x128xi32>
    %5 = arith.remsi %1, %4 : vector<1x128xi32>
    %c0_i32_1 = arith.constant 0 : i32
    %6 = vector.broadcast %c0_i32_1 : i32 to vector<1x128xi32>
    %7 = arith.cmpi ne, %5, %6 : vector<1x128xi32>
    %c0_i32_2 = arith.constant 0 : i32
    %8 = vector.broadcast %c0_i32_2 : i32 to vector<1x128xi32>
    %9 = arith.cmpi slt, %5, %8 : vector<1x128xi32>
    %c0_i32_3 = arith.constant 0 : i32
    %10 = arith.cmpi slt, %3, %c0_i32_3 : i32
    %11 = vector.broadcast %10 : i1 to vector<1x128xi1>
    %12 = vector.broadcast %11 : vector<1x128xi1> to vector<1x128xi1>
    %13 = arith.xori %9, %12 : vector<1x128xi1>
    %14 = arith.andi %13, %7 : vector<1x128xi1>
    %15 = vector.broadcast %3 : i32 to vector<1x128xi32>
    %16 = arith.addi %5, %15 : vector<1x128xi32>
    %17 = arith.select %14, %16, %5 : vector<1x128xi1>, vector<1x128xi32>
    %cst = arith.constant 0.000000e+00 : bf16
    %18 = vector.broadcast %cst : bf16 to vector<16x1xbf16>
    %19 = vector.extract_strided_slice %0 {offsets = [0, 0], sizes = [16, 127], strides = [1, 1]} : vector<16x128xbf16> to vector<16x127xbf16>
    %20 = tpu.concatenate %18, %19 in 1 : vector<16x1xbf16>, vector<16x127xbf16> -> vector<16x128xbf16>
    %c1_i32_4 = arith.constant 1 : i32
    %21 = vector.broadcast %c1_i32_4 : i32 to vector<1x128xi32>
    %22 = arith.cmpi sge, %17, %21 : vector<1x128xi32>
    %c17_i32 = arith.constant 17 : i32
    %23 = vector.broadcast %c17_i32 : i32 to vector<1x128xi32>
    %24 = arith.cmpi slt, %17, %23 : vector<1x128xi32>
    %25 = arith.andi %22, %24 : vector<1x128xi1>
    %cst_5 = arith.constant 0.000000e+00 : bf16
    %26 = vector.broadcast %cst_5 : bf16 to vector<16x128xbf16>
    %27 = vector.shape_cast %25 : vector<1x128xi1> to vector<1x128xi1>
    %28 = vector.broadcast %27 : vector<1x128xi1> to vector<16x128xi1>
    %29 = arith.select %28, %20, %26 : vector<16x128xi1>, vector<16x128xbf16>
    %c0_i32_6 = arith.constant 0 : i32
    %30 = vector.broadcast %c0_i32_6 : i32 to vector<1x128xi32>
    %31 = arith.cmpi sge, %17, %30 : vector<1x128xi32>
    %c16_i32_7 = arith.constant 16 : i32
    %32 = vector.broadcast %c16_i32_7 : i32 to vector<1x128xi32>
    %33 = arith.cmpi slt, %17, %32 : vector<1x128xi32>
    %34 = arith.andi %31, %33 : vector<1x128xi1>
    %cst_8 = arith.constant 0.000000e+00 : bf16
    %35 = vector.broadcast %cst_8 : bf16 to vector<16x128xbf16>
    %36 = vector.shape_cast %34 : vector<1x128xi1> to vector<1x128xi1>
    %37 = vector.broadcast %36 : vector<1x128xi1> to vector<16x128xi1>
    %38 = arith.select %37, %0, %35 : vector<16x128xi1>, vector<16x128xbf16>
    %39 = vector.extract_strided_slice %0 {offsets = [0, 1], sizes = [16, 127], strides = [1, 1]} : vector<16x128xbf16> to vector<16x127xbf16>
    %cst_9 = arith.constant 0.000000e+00 : bf16
    %40 = vector.broadcast %cst_9 : bf16 to vector<16x1xbf16>
    %41 = tpu.concatenate %39, %40 in 1 : vector<16x127xbf16>, vector<16x1xbf16> -> vector<16x128xbf16>
    %c-1_i32 = arith.constant -1 : i32
    %42 = vector.broadcast %c-1_i32 : i32 to vector<1x128xi32>
    %43 = arith.cmpi sge, %17, %42 : vector<1x128xi32>
    %c15_i32 = arith.constant 15 : i32
    %44 = vector.broadcast %c15_i32 : i32 to vector<1x128xi32>
    %45 = arith.cmpi slt, %17, %44 : vector<1x128xi32>
    %46 = arith.andi %43, %45 : vector<1x128xi1>
    %cst_10 = arith.constant 0.000000e+00 : bf16
    %47 = vector.broadcast %cst_10 : bf16 to vector<16x128xbf16>
    %48 = vector.shape_cast %46 : vector<1x128xi1> to vector<1x128xi1>
    %49 = vector.broadcast %48 : vector<1x128xi1> to vector<16x128xi1>
    %50 = arith.select %49, %41, %47 : vector<16x128xi1>, vector<16x128xbf16>
    %51 = tpu.concatenate %29, %38, %50 in 0 : vector<16x128xbf16>, vector<16x128xbf16>, vector<16x128xbf16> -> vector<48x128xbf16>
    %c0_11 = arith.constant 0 : index
    %c0_12 = arith.constant 0 : index
    %52 = vector.load %arg2[%c0_11, %c0_12] : memref<32x48xbf16, #tpu.memory_space<vmem>>, vector<32x48xbf16>
    %cst_13 = arith.constant dense<0.000000e+00> : vector<32x128xf32>
    %53 = tpu.matmul %52, %51, %cst_13 {dimension_numbers = #tpu.dot_dimension_numbers<[1], [0], [0], [1], [0, 0, 1, 1], [], []>} : vector<32x48xbf16>, vector<48x128xbf16>, vector<32x128xf32> -> vector<32x128xf32>
    %c0_14 = arith.constant 0 : index
    %c0_15 = arith.constant 0 : index
    %54 = vector.load %arg3[%c0_14, %c0_15] : memref<32x1xf32, #tpu.memory_space<vmem>>, vector<32x1xf32>
    %55 = vector.broadcast %54 : vector<32x1xf32> to vector<32x128xf32>
    %56 = arith.addf %53, %55 : vector<32x128xf32>
    %cst_16 = arith.constant 0.000000e+00 : f32
    %57 = vector.broadcast %cst_16 : f32 to vector<32x128xf32>
    %58 = arith.maximumf %56, %57 : vector<32x128xf32>
    %c0_17 = arith.constant 0 : index
    %c0_18 = arith.constant 0 : index
    %59 = vector.load %arg4[%c0_17, %c0_18] : memref<32x1xf32, #tpu.memory_space<vmem>>, vector<32x1xf32>
    %60 = vector.broadcast %59 : vector<32x1xf32> to vector<32x128xf32>
    %61 = arith.mulf %58, %60 : vector<32x128xf32>
    %c0_19 = arith.constant 0 : index
    %c0_20 = arith.constant 0 : index
    %62 = vector.load %arg5[%c0_19, %c0_20] : memref<32x1xf32, #tpu.memory_space<vmem>>, vector<32x1xf32>
    %63 = vector.broadcast %62 : vector<32x1xf32> to vector<32x128xf32>
    %64 = arith.addf %61, %63 : vector<32x128xf32>
    %65 = arith.truncf %64 : vector<32x128xf32> to vector<32x128xbf16>
    %66 = tpu.iota {dimensions = array<i32: 1>} : vector<1x128xi32>
    %c16_i32_21 = arith.constant 16 : i32
    %c0_i32_22 = arith.constant 0 : i32
    %67 = arith.cmpi eq, %c16_i32_21, %c0_i32_22 : i32
    %c1_i32_23 = arith.constant 1 : i32
    %68 = arith.select %67, %c1_i32_23, %c16_i32_21 : i32
    %69 = vector.broadcast %68 : i32 to vector<1x128xi32>
    %70 = arith.remsi %66, %69 : vector<1x128xi32>
    %c0_i32_24 = arith.constant 0 : i32
    %71 = vector.broadcast %c0_i32_24 : i32 to vector<1x128xi32>
    %72 = arith.cmpi ne, %70, %71 : vector<1x128xi32>
    %c0_i32_25 = arith.constant 0 : i32
    %73 = vector.broadcast %c0_i32_25 : i32 to vector<1x128xi32>
    %74 = arith.cmpi slt, %70, %73 : vector<1x128xi32>
    %c0_i32_26 = arith.constant 0 : i32
    %75 = arith.cmpi slt, %68, %c0_i32_26 : i32
    %76 = vector.broadcast %75 : i1 to vector<1x128xi1>
    %77 = vector.broadcast %76 : vector<1x128xi1> to vector<1x128xi1>
    %78 = arith.xori %74, %77 : vector<1x128xi1>
    %79 = arith.andi %78, %72 : vector<1x128xi1>
    %80 = vector.broadcast %68 : i32 to vector<1x128xi32>
    %81 = arith.addi %70, %80 : vector<1x128xi32>
    %82 = arith.select %79, %81, %70 : vector<1x128xi1>, vector<1x128xi32>
    %cst_27 = arith.constant 0.000000e+00 : bf16
    %83 = vector.broadcast %cst_27 : bf16 to vector<32x1xbf16>
    %84 = vector.extract_strided_slice %65 {offsets = [0, 0], sizes = [32, 127], strides = [1, 1]} : vector<32x128xbf16> to vector<32x127xbf16>
    %85 = tpu.concatenate %83, %84 in 1 : vector<32x1xbf16>, vector<32x127xbf16> -> vector<32x128xbf16>
    %c1_i32_28 = arith.constant 1 : i32
    %86 = vector.broadcast %c1_i32_28 : i32 to vector<1x128xi32>
    %87 = arith.cmpi sge, %82, %86 : vector<1x128xi32>
    %c17_i32_29 = arith.constant 17 : i32
    %88 = vector.broadcast %c17_i32_29 : i32 to vector<1x128xi32>
    %89 = arith.cmpi slt, %82, %88 : vector<1x128xi32>
    %90 = arith.andi %87, %89 : vector<1x128xi1>
    %cst_30 = arith.constant 0.000000e+00 : bf16
    %91 = vector.broadcast %cst_30 : bf16 to vector<32x128xbf16>
    %92 = vector.shape_cast %90 : vector<1x128xi1> to vector<1x128xi1>
    %93 = vector.broadcast %92 : vector<1x128xi1> to vector<32x128xi1>
    %94 = arith.select %93, %85, %91 : vector<32x128xi1>, vector<32x128xbf16>
    %c0_i32_31 = arith.constant 0 : i32
    %95 = vector.broadcast %c0_i32_31 : i32 to vector<1x128xi32>
    %96 = arith.cmpi sge, %82, %95 : vector<1x128xi32>
    %c16_i32_32 = arith.constant 16 : i32
    %97 = vector.broadcast %c16_i32_32 : i32 to vector<1x128xi32>
    %98 = arith.cmpi slt, %82, %97 : vector<1x128xi32>
    %99 = arith.andi %96, %98 : vector<1x128xi1>
    %cst_33 = arith.constant 0.000000e+00 : bf16
    %100 = vector.broadcast %cst_33 : bf16 to vector<32x128xbf16>
    %101 = vector.shape_cast %99 : vector<1x128xi1> to vector<1x128xi1>
    %102 = vector.broadcast %101 : vector<1x128xi1> to vector<32x128xi1>
    %103 = arith.select %102, %65, %100 : vector<32x128xi1>, vector<32x128xbf16>
    %104 = vector.extract_strided_slice %65 {offsets = [0, 1], sizes = [32, 127], strides = [1, 1]} : vector<32x128xbf16> to vector<32x127xbf16>
    %cst_34 = arith.constant 0.000000e+00 : bf16
    %105 = vector.broadcast %cst_34 : bf16 to vector<32x1xbf16>
    %106 = tpu.concatenate %104, %105 in 1 : vector<32x127xbf16>, vector<32x1xbf16> -> vector<32x128xbf16>
    %c-1_i32_35 = arith.constant -1 : i32
    %107 = vector.broadcast %c-1_i32_35 : i32 to vector<1x128xi32>
    %108 = arith.cmpi sge, %82, %107 : vector<1x128xi32>
    %c15_i32_36 = arith.constant 15 : i32
    %109 = vector.broadcast %c15_i32_36 : i32 to vector<1x128xi32>
    %110 = arith.cmpi slt, %82, %109 : vector<1x128xi32>
    %111 = arith.andi %108, %110 : vector<1x128xi1>
    %cst_37 = arith.constant 0.000000e+00 : bf16
    %112 = vector.broadcast %cst_37 : bf16 to vector<32x128xbf16>
    %113 = vector.shape_cast %111 : vector<1x128xi1> to vector<1x128xi1>
    %114 = vector.broadcast %113 : vector<1x128xi1> to vector<32x128xi1>
    %115 = arith.select %114, %106, %112 : vector<32x128xi1>, vector<32x128xbf16>
    %116 = tpu.concatenate %94, %103, %115 in 0 : vector<32x128xbf16>, vector<32x128xbf16>, vector<32x128xbf16> -> vector<96x128xbf16>
    %c0_38 = arith.constant 0 : index
    %c0_39 = arith.constant 0 : index
    %117 = vector.load %arg6[%c0_38, %c0_39] : memref<32x96xbf16, #tpu.memory_space<vmem>>, vector<32x96xbf16>
    %cst_40 = arith.constant dense<0.000000e+00> : vector<32x128xf32>
    %118 = tpu.matmul %117, %116, %cst_40 {dimension_numbers = #tpu.dot_dimension_numbers<[1], [0], [0], [1], [0, 0, 1, 1], [], []>} : vector<32x96xbf16>, vector<96x128xbf16>, vector<32x128xf32> -> vector<32x128xf32>
    %c0_41 = arith.constant 0 : index
    %c0_42 = arith.constant 0 : index
    %119 = vector.load %arg7[%c0_41, %c0_42] : memref<32x1xf32, #tpu.memory_space<vmem>>, vector<32x1xf32>
    %120 = vector.broadcast %119 : vector<32x1xf32> to vector<32x128xf32>
    %121 = arith.addf %118, %120 : vector<32x128xf32>
    %cst_43 = arith.constant 0.000000e+00 : f32
    %122 = vector.broadcast %cst_43 : f32 to vector<32x128xf32>
    %123 = arith.maximumf %121, %122 : vector<32x128xf32>
    %c0_44 = arith.constant 0 : index
    %c0_45 = arith.constant 0 : index
    %124 = vector.load %arg8[%c0_44, %c0_45] : memref<32x1xf32, #tpu.memory_space<vmem>>, vector<32x1xf32>
    %125 = vector.broadcast %124 : vector<32x1xf32> to vector<32x128xf32>
    %126 = arith.mulf %123, %125 : vector<32x128xf32>
    %c0_46 = arith.constant 0 : index
    %c0_47 = arith.constant 0 : index
    %127 = vector.load %arg9[%c0_46, %c0_47] : memref<32x1xf32, #tpu.memory_space<vmem>>, vector<32x1xf32>
    %128 = vector.broadcast %127 : vector<32x1xf32> to vector<32x128xf32>
    %129 = arith.addf %126, %128 : vector<32x128xf32>
    %130 = arith.truncf %129 : vector<32x128xf32> to vector<32x128xbf16>
    %131 = tpu.iota {dimensions = array<i32: 1>} : vector<1x128xi32>
    %c16_i32_48 = arith.constant 16 : i32
    %c0_i32_49 = arith.constant 0 : i32
    %132 = arith.cmpi eq, %c16_i32_48, %c0_i32_49 : i32
    %c1_i32_50 = arith.constant 1 : i32
    %133 = arith.select %132, %c1_i32_50, %c16_i32_48 : i32
    %134 = vector.broadcast %133 : i32 to vector<1x128xi32>
    %135 = arith.remsi %131, %134 : vector<1x128xi32>
    %c0_i32_51 = arith.constant 0 : i32
    %136 = vector.broadcast %c0_i32_51 : i32 to vector<1x128xi32>
    %137 = arith.cmpi ne, %135, %136 : vector<1x128xi32>
    %c0_i32_52 = arith.constant 0 : i32
    %138 = vector.broadcast %c0_i32_52 : i32 to vector<1x128xi32>
    %139 = arith.cmpi slt, %135, %138 : vector<1x128xi32>
    %c0_i32_53 = arith.constant 0 : i32
    %140 = arith.cmpi slt, %133, %c0_i32_53 : i32
    %141 = vector.broadcast %140 : i1 to vector<1x128xi1>
    %142 = vector.broadcast %141 : vector<1x128xi1> to vector<1x128xi1>
    %143 = arith.xori %139, %142 : vector<1x128xi1>
    %144 = arith.andi %143, %137 : vector<1x128xi1>
    %145 = vector.broadcast %133 : i32 to vector<1x128xi32>
    %146 = arith.addi %135, %145 : vector<1x128xi32>
    %147 = arith.select %144, %146, %135 : vector<1x128xi1>, vector<1x128xi32>
    %cst_54 = arith.constant 0.000000e+00 : bf16
    %148 = vector.broadcast %cst_54 : bf16 to vector<32x1xbf16>
    %149 = vector.extract_strided_slice %130 {offsets = [0, 0], sizes = [32, 127], strides = [1, 1]} : vector<32x128xbf16> to vector<32x127xbf16>
    %150 = tpu.concatenate %148, %149 in 1 : vector<32x1xbf16>, vector<32x127xbf16> -> vector<32x128xbf16>
    %c1_i32_55 = arith.constant 1 : i32
    %151 = vector.broadcast %c1_i32_55 : i32 to vector<1x128xi32>
    %152 = arith.cmpi sge, %147, %151 : vector<1x128xi32>
    %c17_i32_56 = arith.constant 17 : i32
    %153 = vector.broadcast %c17_i32_56 : i32 to vector<1x128xi32>
    %154 = arith.cmpi slt, %147, %153 : vector<1x128xi32>
    %155 = arith.andi %152, %154 : vector<1x128xi1>
    %cst_57 = arith.constant 0.000000e+00 : bf16
    %156 = vector.broadcast %cst_57 : bf16 to vector<32x128xbf16>
    %157 = vector.shape_cast %155 : vector<1x128xi1> to vector<1x128xi1>
    %158 = vector.broadcast %157 : vector<1x128xi1> to vector<32x128xi1>
    %159 = arith.select %158, %150, %156 : vector<32x128xi1>, vector<32x128xbf16>
    %c0_i32_58 = arith.constant 0 : i32
    %160 = vector.broadcast %c0_i32_58 : i32 to vector<1x128xi32>
    %161 = arith.cmpi sge, %147, %160 : vector<1x128xi32>
    %c16_i32_59 = arith.constant 16 : i32
    %162 = vector.broadcast %c16_i32_59 : i32 to vector<1x128xi32>
    %163 = arith.cmpi slt, %147, %162 : vector<1x128xi32>
    %164 = arith.andi %161, %163 : vector<1x128xi1>
    %cst_60 = arith.constant 0.000000e+00 : bf16
    %165 = vector.broadcast %cst_60 : bf16 to vector<32x128xbf16>
    %166 = vector.shape_cast %164 : vector<1x128xi1> to vector<1x128xi1>
    %167 = vector.broadcast %166 : vector<1x128xi1> to vector<32x128xi1>
    %168 = arith.select %167, %130, %165 : vector<32x128xi1>, vector<32x128xbf16>
    %169 = vector.extract_strided_slice %130 {offsets = [0, 1], sizes = [32, 127], strides = [1, 1]} : vector<32x128xbf16> to vector<32x127xbf16>
    %cst_61 = arith.constant 0.000000e+00 : bf16
    %170 = vector.broadcast %cst_61 : bf16 to vector<32x1xbf16>
    %171 = tpu.concatenate %169, %170 in 1 : vector<32x127xbf16>, vector<32x1xbf16> -> vector<32x128xbf16>
    %c-1_i32_62 = arith.constant -1 : i32
    %172 = vector.broadcast %c-1_i32_62 : i32 to vector<1x128xi32>
    %173 = arith.cmpi sge, %147, %172 : vector<1x128xi32>
    %c15_i32_63 = arith.constant 15 : i32
    %174 = vector.broadcast %c15_i32_63 : i32 to vector<1x128xi32>
    %175 = arith.cmpi slt, %147, %174 : vector<1x128xi32>
    %176 = arith.andi %173, %175 : vector<1x128xi1>
    %cst_64 = arith.constant 0.000000e+00 : bf16
    %177 = vector.broadcast %cst_64 : bf16 to vector<32x128xbf16>
    %178 = vector.shape_cast %176 : vector<1x128xi1> to vector<1x128xi1>
    %179 = vector.broadcast %178 : vector<1x128xi1> to vector<32x128xi1>
    %180 = arith.select %179, %171, %177 : vector<32x128xi1>, vector<32x128xbf16>
    %181 = tpu.concatenate %159, %168, %180 in 0 : vector<32x128xbf16>, vector<32x128xbf16>, vector<32x128xbf16> -> vector<96x128xbf16>
    %c0_65 = arith.constant 0 : index
    %c0_66 = arith.constant 0 : index
    %182 = vector.load %arg10[%c0_65, %c0_66] : memref<32x96xbf16, #tpu.memory_space<vmem>>, vector<32x96xbf16>
    %cst_67 = arith.constant dense<0.000000e+00> : vector<32x128xf32>
    %183 = tpu.matmul %182, %181, %cst_67 {dimension_numbers = #tpu.dot_dimension_numbers<[1], [0], [0], [1], [0, 0, 1, 1], [], []>} : vector<32x96xbf16>, vector<96x128xbf16>, vector<32x128xf32> -> vector<32x128xf32>
    %c0_68 = arith.constant 0 : index
    %c0_69 = arith.constant 0 : index
    %184 = vector.load %arg11[%c0_68, %c0_69] : memref<32x1xf32, #tpu.memory_space<vmem>>, vector<32x1xf32>
    %185 = vector.broadcast %184 : vector<32x1xf32> to vector<32x128xf32>
    %186 = arith.addf %183, %185 : vector<32x128xf32>
    %cst_70 = arith.constant 0.000000e+00 : f32
    %187 = vector.broadcast %cst_70 : f32 to vector<32x128xf32>
    %188 = arith.maximumf %186, %187 : vector<32x128xf32>
    %c0_71 = arith.constant 0 : index
    %c0_72 = arith.constant 0 : index
    %189 = vector.load %arg12[%c0_71, %c0_72] : memref<32x1xf32, #tpu.memory_space<vmem>>, vector<32x1xf32>
    %190 = vector.broadcast %189 : vector<32x1xf32> to vector<32x128xf32>
    %191 = arith.mulf %188, %190 : vector<32x128xf32>
    %c0_73 = arith.constant 0 : index
    %c0_74 = arith.constant 0 : index
    %192 = vector.load %arg13[%c0_73, %c0_74] : memref<32x1xf32, #tpu.memory_space<vmem>>, vector<32x1xf32>
    %193 = vector.broadcast %192 : vector<32x1xf32> to vector<32x128xf32>
    %194 = arith.addf %191, %193 : vector<32x128xf32>
    %c0_75 = arith.constant 0 : index
    %c0_76 = arith.constant 0 : index
    %195 = vector.load %arg14[%c0_75, %c0_76] : memref<32x128xf32, #tpu.memory_space<vmem>>, vector<32x128xf32>
    tpu.vector_store %arg14[%c0_75, %c0_76], %194 {strides = array<i32>} : memref<32x128xf32, #tpu.memory_space<vmem>>, vector<32x128xf32>,
    return
  }
  func.func @transform_0(%arg0: i32) -> (i32, i32) {
    %c0_i32 = arith.constant 0 : i32
    %c0_i32_0 = arith.constant 0 : i32
    %c0_i32_1 = arith.constant 0 : i32
    return %c0_i32, %c0_i32_0 : i32, i32
  }
  func.func @transform_1(%arg0: i32) -> (i32, i32) {
    %c0_i32 = arith.constant 0 : i32
    %c0_i32_0 = arith.constant 0 : i32
    %c0_i32_1 = arith.constant 0 : i32
    return %c0_i32, %c0_i32_0 : i32, i32
  }
  func.func @transform_2(%arg0: i32) -> (i32, i32) {
    %c0_i32 = arith.constant 0 : i32
    %c0_i32_0 = arith.constant 0 : i32
    %c0_i32_1 = arith.constant 0 : i32
    return %c0_i32, %c0_i32_0 : i32, i32
  }
  func.func @transform_3(%arg0: i32) -> (i32, i32) {
    %c0_i32 = arith.constant 0 : i32
    %c0_i32_0 = arith.constant 0 : i32
    %c0_i32_1 = arith.constant 0 : i32
    return %c0_i32, %c0_i32_0 : i32, i32
  }
  func.func @transform_4(%arg0: i32) -> (i32, i32) {
    %c0_i32 = arith.constant 0 : i32
    %c0_i32_0 = arith.constant 0 : i32
    %c0_i32_1 = arith.constant 0 : i32
    return %c0_i32, %c0_i32_0 : i32, i32
  }
  func.func @transform_5(%arg0: i32) -> (i32, i32) {
    %c0_i32 = arith.constant 0 : i32
    %c0_i32_0 = arith.constant 0 : i32
    %c0_i32_1 = arith.constant 0 : i32
    return %c0_i32, %c0_i32_0 : i32, i32
  }
  func.func @transform_6(%arg0: i32) -> (i32, i32) {
    %c0_i32 = arith.constant 0 : i32
    %c0_i32_0 = arith.constant 0 : i32
    %c0_i32_1 = arith.constant 0 : i32
    return %c0_i32, %c0_i32_0 : i32, i32
  }
  func.func @transform_7(%arg0: i32) -> (i32, i32) {
    %c0_i32 = arith.constant 0 : i32
    %c0_i32_0 = arith.constant 0 : i32
    %c0_i32_1 = arith.constant 0 : i32
    return %c0_i32, %c0_i32_0 : i32, i32
  }
  func.func @transform_8(%arg0: i32) -> (i32, i32) {
    %c0_i32 = arith.constant 0 : i32
    %c0_i32_0 = arith.constant 0 : i32
    %c0_i32_1 = arith.constant 0 : i32
    return %c0_i32, %c0_i32_0 : i32, i32
  }
  func.func @transform_9(%arg0: i32) -> (i32, i32) {
    %c0_i32 = arith.constant 0 : i32
    %c0_i32_0 = arith.constant 0 : i32
    %c0_i32_1 = arith.constant 0 : i32
    return %c0_i32, %c0_i32_0 : i32, i32
  }
  func.func @transform_10(%arg0: i32) -> (i32, i32) {
    %c0_i32 = arith.constant 0 : i32
    %c0_i32_0 = arith.constant 0 : i32
    %c0_i32_1 = arith.constant 0 : i32
    return %c0_i32, %c0_i32_0 : i32, i32
  }
  func.func @transform_11(%arg0: i32) -> (i32, i32) {
    %c0_i32 = arith.constant 0 : i32
    %c0_i32_0 = arith.constant 0 : i32
    %c0_i32_1 = arith.constant 0 : i32
    return %c0_i32, %c0_i32_0 : i32, i32
  }
  func.func @transform_12(%arg0: i32) -> (i32, i32) {
    %c0_i32 = arith.constant 0 : i32
    %c0_i32_0 = arith.constant 0 : i32
    %c0_i32_1 = arith.constant 0 : i32
    return %c0_i32, %c0_i32_0 : i32, i32
  }
  func.func @transform_13(%arg0: i32) -> (i32, i32) {
    %c0_i32 = arith.constant 0 : i32
    %c0_i32_0 = arith.constant 0 : i32
    %c0_i32_1 = arith.constant 0 : i32
    return %c0_i32, %c0_i32_0 : i32, i32
  }
}

module attributes {stable_mosaic.version = 11 : i64} {
  func.func @_bilstm_kernel(%arg0: i32, %arg1: memref<16x2x32xf32, #tpu.memory_space<vmem>>, %arg2: memref<2x1xi32, #tpu.memory_space<vmem>>, %arg3: memref<32x128xf32, #tpu.memory_space<vmem>>, %arg4: memref<32x128xf32, #tpu.memory_space<vmem>>, %arg5: memref<1x128xf32, #tpu.memory_space<vmem>>, %arg6: memref<32x128xf32, #tpu.memory_space<vmem>>, %arg7: memref<32x128xf32, #tpu.memory_space<vmem>>, %arg8: memref<1x128xf32, #tpu.memory_space<vmem>>, %arg9: memref<16x2x32xf32, #tpu.memory_space<vmem>>, %arg10: memref<16x2x32xf32, #tpu.memory_space<vmem>>) attributes {dimension_semantics = [#tpu.dimension_semantics<arbitrary>], iteration_bounds = array<i64: 1>, scalar_prefetch = 0 : i64, scratch_operands = 0 : i64, tpu.core_type = #tpu.core_type<tc>, window_params = [{pipeline_mode = #tpu.pipeline_mode<synchronous>, transform_indices = @transform_0, window_bounds = array<i64: 16, 2, 32>}, {pipeline_mode = #tpu.pipeline_mode<synchronous>, transform_indices = @transform_1, window_bounds = array<i64: 2, 1>}, {pipeline_mode = #tpu.pipeline_mode<synchronous>, transform_indices = @transform_2, window_bounds = array<i64: 32, 128>}, {pipeline_mode = #tpu.pipeline_mode<synchronous>, transform_indices = @transform_3, window_bounds = array<i64: 32, 128>}, {pipeline_mode = #tpu.pipeline_mode<synchronous>, transform_indices = @transform_4, window_bounds = array<i64: 1, 128>}, {pipeline_mode = #tpu.pipeline_mode<synchronous>, transform_indices = @transform_5, window_bounds = array<i64: 32, 128>}, {pipeline_mode = #tpu.pipeline_mode<synchronous>, transform_indices = @transform_6, window_bounds = array<i64: 32, 128>}, {pipeline_mode = #tpu.pipeline_mode<synchronous>, transform_indices = @transform_7, window_bounds = array<i64: 1, 128>}, {pipeline_mode = #tpu.pipeline_mode<synchronous>, transform_indices = @transform_8, window_bounds = array<i64: 16, 2, 32>}, {pipeline_mode = #tpu.pipeline_mode<synchronous>, transform_indices = @transform_9, window_bounds = array<i64: 16, 2, 32>}]} {
    %c0 = arith.constant 0 : index
    %c0_0 = arith.constant 0 : index
    %0 = vector.load %arg2[%c0, %c0_0] : memref<2x1xi32, #tpu.memory_space<vmem>>, vector<2x1xi32>
    %cst = arith.constant 0.000000e+00 : f32
    %1 = vector.broadcast %cst : f32 to vector<2x32xf32>
    %c0_i32 = arith.constant 0 : i32
    %c16_i32 = arith.constant 16 : i32
    %2 = arith.addi %c0_i32, %c16_i32 : i32
    %c1_i32 = arith.constant 1 : i32
    %3:4 = scf.for %arg11 = %c0_i32 to %2 step %c1_i32 iter_args(%arg12 = %1, %arg13 = %1, %arg14 = %1, %arg15 = %1) -> (vector<2x32xf32>, vector<2x32xf32>, vector<2x32xf32>, vector<2x32xf32>)  : i32 {
      %4 = arith.index_cast %arg11 : i32 to index
      %c0_2 = arith.constant 0 : index
      %c0_3 = arith.constant 0 : index
      %5 = vector.load %arg1[%4, %c0_2, %c0_3] : memref<16x2x32xf32, #tpu.memory_space<vmem>>, vector<1x2x32xf32>
      %6 = vector.shape_cast %5 : vector<1x2x32xf32> to vector<2x32xf32>
      %c0_4 = arith.constant 0 : index
      %c0_5 = arith.constant 0 : index
      %7 = vector.load %arg3[%c0_4, %c0_5] : memref<32x128xf32, #tpu.memory_space<vmem>>, vector<32x128xf32>
      %cst_6 = arith.constant dense<0.000000e+00> : vector<2x128xf32>
      %8 = tpu.matmul %6, %7, %cst_6 {dimension_numbers = #tpu.dot_dimension_numbers<[1], [0], [0], [1], [0, 0, 1, 1], [], []>} : vector<2x32xf32>, vector<32x128xf32>, vector<2x128xf32> -> vector<2x128xf32>
      %c0_7 = arith.constant 0 : index
      %c0_8 = arith.constant 0 : index
      %9 = vector.load %arg4[%c0_7, %c0_8] : memref<32x128xf32, #tpu.memory_space<vmem>>, vector<32x128xf32>
      %cst_9 = arith.constant dense<0.000000e+00> : vector<2x128xf32>
      %10 = tpu.matmul %arg12, %9, %cst_9 {dimension_numbers = #tpu.dot_dimension_numbers<[1], [0], [0], [1], [0, 0, 1, 1], [], []>} : vector<2x32xf32>, vector<32x128xf32>, vector<2x128xf32> -> vector<2x128xf32>
      %11 = arith.addf %8, %10 : vector<2x128xf32>
      %c0_10 = arith.constant 0 : index
      %c0_11 = arith.constant 0 : index
      %12 = vector.load %arg5[%c0_10, %c0_11] : memref<1x128xf32, #tpu.memory_space<vmem>>, vector<1x128xf32>
      %13 = vector.broadcast %12 : vector<1x128xf32> to vector<2x128xf32>
      %14 = arith.addf %11, %13 : vector<2x128xf32>
      %15 = vector.extract_strided_slice %14 {offsets = [0, 0], sizes = [2, 32], strides = [1, 1]} : vector<2x128xf32> to vector<2x32xf32>
      %cst_12 = arith.constant 0.000000e+00 : f32
      %16 = vector.broadcast %cst_12 : f32 to vector<2x32xf32>
      %17 = arith.subf %16, %15 : vector<2x32xf32>
      %18 = math.exp %17 : vector<2x32xf32>
      %cst_13 = arith.constant 1.000000e+00 : f32
      %19 = vector.broadcast %cst_13 : f32 to vector<2x32xf32>
      %20 = arith.addf %19, %18 : vector<2x32xf32>
      %cst_14 = arith.constant 1.000000e+00 : f32
      %21 = vector.broadcast %cst_14 : f32 to vector<2x32xf32>
      %22 = arith.divf %21, %20 : vector<2x32xf32>
      %23 = vector.extract_strided_slice %14 {offsets = [0, 32], sizes = [2, 32], strides = [1, 1]} : vector<2x128xf32> to vector<2x32xf32>
      %cst_15 = arith.constant 0.000000e+00 : f32
      %24 = vector.broadcast %cst_15 : f32 to vector<2x32xf32>
      %25 = arith.subf %24, %23 : vector<2x32xf32>
      %26 = math.exp %25 : vector<2x32xf32>
      %cst_16 = arith.constant 1.000000e+00 : f32
      %27 = vector.broadcast %cst_16 : f32 to vector<2x32xf32>
      %28 = arith.addf %27, %26 : vector<2x32xf32>
      %cst_17 = arith.constant 1.000000e+00 : f32
      %29 = vector.broadcast %cst_17 : f32 to vector<2x32xf32>
      %30 = arith.divf %29, %28 : vector<2x32xf32>
      %31 = vector.extract_strided_slice %14 {offsets = [0, 64], sizes = [2, 32], strides = [1, 1]} : vector<2x128xf32> to vector<2x32xf32>
      %32 = math.tanh %31 : vector<2x32xf32>
      %33 = vector.extract_strided_slice %14 {offsets = [0, 96], sizes = [2, 32], strides = [1, 1]} : vector<2x128xf32> to vector<2x32xf32>
      %cst_18 = arith.constant 0.000000e+00 : f32
      %34 = vector.broadcast %cst_18 : f32 to vector<2x32xf32>
      %35 = arith.subf %34, %33 : vector<2x32xf32>
      %36 = math.exp %35 : vector<2x32xf32>
      %cst_19 = arith.constant 1.000000e+00 : f32
      %37 = vector.broadcast %cst_19 : f32 to vector<2x32xf32>
      %38 = arith.addf %37, %36 : vector<2x32xf32>
      %cst_20 = arith.constant 1.000000e+00 : f32
      %39 = vector.broadcast %cst_20 : f32 to vector<2x32xf32>
      %40 = arith.divf %39, %38 : vector<2x32xf32>
      %41 = arith.mulf %30, %arg13 : vector<2x32xf32>
      %42 = arith.mulf %22, %32 : vector<2x32xf32>
      %43 = arith.addf %41, %42 : vector<2x32xf32>
      %44 = math.tanh %43 : vector<2x32xf32>
      %45 = arith.mulf %40, %44 : vector<2x32xf32>
      %46 = vector.broadcast %arg11 : i32 to vector<2x1xi32>
      %47 = arith.cmpi slt, %46, %0 : vector<2x1xi32>
      %cst_21 = arith.constant 0.000000e+00 : f32
      %48 = vector.shape_cast %47 : vector<2x1xi1> to vector<2x1xi1>
      %49 = vector.broadcast %48 : vector<2x1xi1> to vector<2x32xi1>
      %50 = vector.broadcast %cst_21 : f32 to vector<2x32xf32>
      %51 = arith.select %49, %45, %50 : vector<2x32xi1>, vector<2x32xf32>
      %52 = arith.index_cast %arg11 : i32 to index
      %c0_22 = arith.constant 0 : index
      %c0_23 = arith.constant 0 : index
      %53 = vector.load %arg9[%52, %c0_22, %c0_23] : memref<16x2x32xf32, #tpu.memory_space<vmem>>, vector<1x2x32xf32>
      %54 = vector.shape_cast %53 : vector<1x2x32xf32> to vector<2x32xf32>
      %55 = vector.shape_cast %51 : vector<2x32xf32> to vector<1x2x32xf32>
      tpu.vector_store %arg9[%52, %c0_22, %c0_23], %55 {strides = array<i32>} : memref<16x2x32xf32, #tpu.memory_space<vmem>>, vector<1x2x32xf32>,
      %c15_i32 = arith.constant 15 : i32
      %56 = arith.subi %c15_i32, %arg11 : i32
      %57 = arith.index_cast %56 : i32 to index
      %c0_24 = arith.constant 0 : index
      %c0_25 = arith.constant 0 : index
      %58 = vector.load %arg1[%57, %c0_24, %c0_25] : memref<16x2x32xf32, #tpu.memory_space<vmem>>, vector<1x2x32xf32>
      %59 = vector.shape_cast %58 : vector<1x2x32xf32> to vector<2x32xf32>
      %c0_26 = arith.constant 0 : index
      %c0_27 = arith.constant 0 : index
      %60 = vector.load %arg6[%c0_26, %c0_27] : memref<32x128xf32, #tpu.memory_space<vmem>>, vector<32x128xf32>
      %cst_28 = arith.constant dense<0.000000e+00> : vector<2x128xf32>
      %61 = tpu.matmul %59, %60, %cst_28 {dimension_numbers = #tpu.dot_dimension_numbers<[1], [0], [0], [1], [0, 0, 1, 1], [], []>} : vector<2x32xf32>, vector<32x128xf32>, vector<2x128xf32> -> vector<2x128xf32>
      %c0_29 = arith.constant 0 : index
      %c0_30 = arith.constant 0 : index
      %62 = vector.load %arg7[%c0_29, %c0_30] : memref<32x128xf32, #tpu.memory_space<vmem>>, vector<32x128xf32>
      %cst_31 = arith.constant dense<0.000000e+00> : vector<2x128xf32>
      %63 = tpu.matmul %arg14, %62, %cst_31 {dimension_numbers = #tpu.dot_dimension_numbers<[1], [0], [0], [1], [0, 0, 1, 1], [], []>} : vector<2x32xf32>, vector<32x128xf32>, vector<2x128xf32> -> vector<2x128xf32>
      %64 = arith.addf %61, %63 : vector<2x128xf32>
      %c0_32 = arith.constant 0 : index
      %c0_33 = arith.constant 0 : index
      %65 = vector.load %arg8[%c0_32, %c0_33] : memref<1x128xf32, #tpu.memory_space<vmem>>, vector<1x128xf32>
      %66 = vector.broadcast %65 : vector<1x128xf32> to vector<2x128xf32>
      %67 = arith.addf %64, %66 : vector<2x128xf32>
      %68 = vector.extract_strided_slice %67 {offsets = [0, 0], sizes = [2, 32], strides = [1, 1]} : vector<2x128xf32> to vector<2x32xf32>
      %cst_34 = arith.constant 0.000000e+00 : f32
      %69 = vector.broadcast %cst_34 : f32 to vector<2x32xf32>
      %70 = arith.subf %69, %68 : vector<2x32xf32>
      %71 = math.exp %70 : vector<2x32xf32>
      %cst_35 = arith.constant 1.000000e+00 : f32
      %72 = vector.broadcast %cst_35 : f32 to vector<2x32xf32>
      %73 = arith.addf %72, %71 : vector<2x32xf32>
      %cst_36 = arith.constant 1.000000e+00 : f32
      %74 = vector.broadcast %cst_36 : f32 to vector<2x32xf32>
      %75 = arith.divf %74, %73 : vector<2x32xf32>
      %76 = vector.extract_strided_slice %67 {offsets = [0, 32], sizes = [2, 32], strides = [1, 1]} : vector<2x128xf32> to vector<2x32xf32>
      %cst_37 = arith.constant 0.000000e+00 : f32
      %77 = vector.broadcast %cst_37 : f32 to vector<2x32xf32>
      %78 = arith.subf %77, %76 : vector<2x32xf32>
      %79 = math.exp %78 : vector<2x32xf32>
      %cst_38 = arith.constant 1.000000e+00 : f32
      %80 = vector.broadcast %cst_38 : f32 to vector<2x32xf32>
      %81 = arith.addf %80, %79 : vector<2x32xf32>
      %cst_39 = arith.constant 1.000000e+00 : f32
      %82 = vector.broadcast %cst_39 : f32 to vector<2x32xf32>
      %83 = arith.divf %82, %81 : vector<2x32xf32>
      %84 = vector.extract_strided_slice %67 {offsets = [0, 64], sizes = [2, 32], strides = [1, 1]} : vector<2x128xf32> to vector<2x32xf32>
      %85 = math.tanh %84 : vector<2x32xf32>
      %86 = vector.extract_strided_slice %67 {offsets = [0, 96], sizes = [2, 32], strides = [1, 1]} : vector<2x128xf32> to vector<2x32xf32>
      %cst_40 = arith.constant 0.000000e+00 : f32
      %87 = vector.broadcast %cst_40 : f32 to vector<2x32xf32>
      %88 = arith.subf %87, %86 : vector<2x32xf32>
      %89 = math.exp %88 : vector<2x32xf32>
      %cst_41 = arith.constant 1.000000e+00 : f32
      %90 = vector.broadcast %cst_41 : f32 to vector<2x32xf32>
      %91 = arith.addf %90, %89 : vector<2x32xf32>
      %cst_42 = arith.constant 1.000000e+00 : f32
      %92 = vector.broadcast %cst_42 : f32 to vector<2x32xf32>
      %93 = arith.divf %92, %91 : vector<2x32xf32>
      %94 = arith.mulf %83, %arg15 : vector<2x32xf32>
      %95 = arith.mulf %75, %85 : vector<2x32xf32>
      %96 = arith.addf %94, %95 : vector<2x32xf32>
      %97 = math.tanh %96 : vector<2x32xf32>
      %98 = arith.mulf %93, %97 : vector<2x32xf32>
      %99 = vector.broadcast %56 : i32 to vector<2x1xi32>
      %100 = arith.cmpi slt, %99, %0 : vector<2x1xi32>
      %101 = vector.shape_cast %100 : vector<2x1xi1> to vector<2x1xi1>
      %102 = vector.broadcast %101 : vector<2x1xi1> to vector<2x32xi1>
      %103 = arith.select %102, %98, %arg14 : vector<2x32xi1>, vector<2x32xf32>
      %104 = vector.shape_cast %100 : vector<2x1xi1> to vector<2x1xi1>
      %105 = vector.broadcast %104 : vector<2x1xi1> to vector<2x32xi1>
      %106 = arith.select %105, %96, %arg15 : vector<2x32xi1>, vector<2x32xf32>
      %cst_43 = arith.constant 0.000000e+00 : f32
      %107 = vector.shape_cast %100 : vector<2x1xi1> to vector<2x1xi1>
      %108 = vector.broadcast %107 : vector<2x1xi1> to vector<2x32xi1>
      %109 = vector.broadcast %cst_43 : f32 to vector<2x32xf32>
      %110 = arith.select %108, %103, %109 : vector<2x32xi1>, vector<2x32xf32>
      %111 = arith.index_cast %56 : i32 to index
      %c0_44 = arith.constant 0 : index
      %c0_45 = arith.constant 0 : index
      %112 = vector.load %arg10[%111, %c0_44, %c0_45] : memref<16x2x32xf32, #tpu.memory_space<vmem>>, vector<1x2x32xf32>
      %113 = vector.shape_cast %112 : vector<1x2x32xf32> to vector<2x32xf32>
      %114 = vector.shape_cast %110 : vector<2x32xf32> to vector<1x2x32xf32>
      tpu.vector_store %arg10[%111, %c0_44, %c0_45], %114 {strides = array<i32>} : memref<16x2x32xf32, #tpu.memory_space<vmem>>, vector<1x2x32xf32>,
      scf.yield %45, %43, %103, %106 : vector<2x32xf32>, vector<2x32xf32>, vector<2x32xf32>, vector<2x32xf32>
    }
    %c16_i32_1 = arith.constant 16 : i32
    return
  }
  func.func @transform_0(%arg0: i32) -> (i32, i32, i32) {
    %c0_i32 = arith.constant 0 : i32
    %c0_i32_0 = arith.constant 0 : i32
    %c0_i32_1 = arith.constant 0 : i32
    %c0_i32_2 = arith.constant 0 : i32
    return %c0_i32, %c0_i32_0, %c0_i32_1 : i32, i32, i32
  }
  func.func @transform_1(%arg0: i32) -> (i32, i32) {
    %c0_i32 = arith.constant 0 : i32
    %c0_i32_0 = arith.constant 0 : i32
    %c0_i32_1 = arith.constant 0 : i32
    return %c0_i32, %c0_i32_0 : i32, i32
  }
  func.func @transform_2(%arg0: i32) -> (i32, i32) {
    %c0_i32 = arith.constant 0 : i32
    %c0_i32_0 = arith.constant 0 : i32
    %c0_i32_1 = arith.constant 0 : i32
    return %c0_i32, %c0_i32_0 : i32, i32
  }
  func.func @transform_3(%arg0: i32) -> (i32, i32) {
    %c0_i32 = arith.constant 0 : i32
    %c0_i32_0 = arith.constant 0 : i32
    %c0_i32_1 = arith.constant 0 : i32
    return %c0_i32, %c0_i32_0 : i32, i32
  }
  func.func @transform_4(%arg0: i32) -> (i32, i32) {
    %c0_i32 = arith.constant 0 : i32
    %c0_i32_0 = arith.constant 0 : i32
    %c0_i32_1 = arith.constant 0 : i32
    return %c0_i32, %c0_i32_0 : i32, i32
  }
  func.func @transform_5(%arg0: i32) -> (i32, i32) {
    %c0_i32 = arith.constant 0 : i32
    %c0_i32_0 = arith.constant 0 : i32
    %c0_i32_1 = arith.constant 0 : i32
    return %c0_i32, %c0_i32_0 : i32, i32
  }
  func.func @transform_6(%arg0: i32) -> (i32, i32) {
    %c0_i32 = arith.constant 0 : i32
    %c0_i32_0 = arith.constant 0 : i32
    %c0_i32_1 = arith.constant 0 : i32
    return %c0_i32, %c0_i32_0 : i32, i32
  }
  func.func @transform_7(%arg0: i32) -> (i32, i32) {
    %c0_i32 = arith.constant 0 : i32
    %c0_i32_0 = arith.constant 0 : i32
    %c0_i32_1 = arith.constant 0 : i32
    return %c0_i32, %c0_i32_0 : i32, i32
  }
  func.func @transform_8(%arg0: i32) -> (i32, i32, i32) {
    %c0_i32 = arith.constant 0 : i32
    %c0_i32_0 = arith.constant 0 : i32
    %c0_i32_1 = arith.constant 0 : i32
    %c0_i32_2 = arith.constant 0 : i32
    return %c0_i32, %c0_i32_0, %c0_i32_1 : i32, i32, i32
  }
  func.func @transform_9(%arg0: i32) -> (i32, i32, i32) {
    %c0_i32 = arith.constant 0 : i32
    %c0_i32_0 = arith.constant 0 : i32
    %c0_i32_1 = arith.constant 0 : i32
    %c0_i32_2 = arith.constant 0 : i32
    return %c0_i32, %c0_i32_0, %c0_i32_1 : i32, i32, i32
  }
}

</mosaic_0001>

<bundles_post_ra>
// kernel: nar_taco_encoder_forward.3
= control target key start
LH: loop header
LB: loop body
LE: loop exit
PB: predicated region body
PF: predicated region fallthrough
CT: control target
= control target key end

     0   :  { %v477_v1 = vmov 0.0   ;;  %v479_v2 = vmov 0.0   ;;  %v481_v3 = vmov 0.0   ;;  %v483_v4 = vmov 0.0   ;;  %s485_s11 = smov 0   ;;  %s613_s0 = inlined_call_operand.vmem [shape: f32[16,2,32], index: 0, kind: input, shape index: {}]   ;;  %s614_s1 = inlined_call_operand.vmem [shape: s32[2,1], index: 1, kind: input, shape index: {}]   ;;  %s615_s2 = inlined_call_operand.vmem [shape: f32[32,128], index: 2, kind: input, shape index: {}]   ;;  %s616_s3 = inlined_call_operand.vmem [shape: f32[32,128], index: 3, kind: input, shape index: {}]   ;;  %s617_s4 = inlined_call_operand.vmem [shape: f32[1,128], index: 4, kind: input, shape index: {}]   ;;  %s618_s5 = inlined_call_operand.vmem [shape: f32[32,128], index: 5, kind: input, shape index: {}]   ;;  %s619_s6 = inlined_call_operand.vmem [shape: f32[32,128], index: 6, kind: input, shape index: {}]   ;;  %s620_s7 = inlined_call_operand.vmem [shape: f32[1,128], index: 7, kind: input, shape index: {}]   ;;  %s621_s8 = inlined_call_operand.vmem [shape: f32[16,2,32], index: 8, kind: output, shape index: {0}]   ;;  %s622_s9 = inlined_call_operand.vmem [shape: f32[16,2,32], index: 9, kind: output, shape index: {1}]  }
   0x1   :  { %v475_v0 = vld [vmem:[%s614_s1] sm:$0x3] }
   0x2 LB: > { %v170_v5 = vld [vmem:[%s619_s6 + $0x18] sm:$0xff]  ;;  %v169_v7 = vld [vmem:[%s619_s6 + $0x10] sm:$0xff]  ;;  %s419_s19 = smov 32   ;;  %v168_v9 = vld [vmem:[%s619_s6 + $0x8] sm:$0xff]  ;;  %s159_s28 = ssub.s32 15, %s417_s11  ;;  %vm56_vm0 = vcmask 261120   ;;  %s417_s11 = sphi %s485_s11, %s37_s11   ;;  %v413_v4 = vphi %v483_v4, %v143_v4   ;;  %v409_v3 = vphi %v481_v3, %v137_v3   ;;  %v405_v2 = vphi %v479_v2, %v268_v2   ;;  %v401_v1 = vphi %v477_v1, %v269_v1  }
   0x3   : > { %v166_v6 = vld [vmem:[%s618_s5 + $0x18] sm:$0xff]  ;;  %188 = vmatpush.msra.mxu2 %v170_v5  ;;  %v165_v8 = vld [vmem:[%s618_s5 + $0x10] sm:$0xff]  ;;  %172 = vrot.lane.b32.xlu0 %v405_v2, %s419_s19  ;;  %v164_v10 = vld [vmem:[%s618_s5 + $0x8] sm:$0xff]  ;;  %s530_s29 = sshll.u32 %s159_s28, 1  ;;  %s310_s21 = sshll.u32 %s417_s11, 1  ;;  %vm157_vm13 = vcmask 254976  }
   0x4   : > { %211 = vmatpush.msra.mxu3 %v166_v6  ;;  %v167_v11 = vld [vmem:[%s619_s6] sm:$0xff]  ;;  %s161_s1 = scalar_lea.vmem %s613_s0, %s530_s29  ;;  %v52_v14 = vld [vmem:[%s616_s3 + $0x18] sm:$0xff]  ;;  %v51_v16 = vld [vmem:[%s616_s3 + $0x10] sm:$0xff]  ;;  %s43_s13 = scalar_lea.vmem %s613_s0, %s310_s21 }
   0x5   : > { %189 = vmatpush.msra.mxu2 %v169_v7  ;;  %v163_v12 = vld [vmem:[%s618_s5] sm:$0xff]  ;;  %v48_v15 = vld [vmem:[%s615_s2 + $0x18] sm:$0xff]  ;;  %71 = vmatpush.msra.mxu0 %v52_v14  ;;  %v47_v17 = vld [vmem:[%s615_s2 + $0x10] sm:$0xff]  ;;  %s420_s18 = smov 64   ;;  %s275_s22 = scalar_lea.vmem %s622_s9, %s530_s29 }
   0x6   : > { %212 = vmatpush.msra.mxu3 %v165_v8  ;;  %v162_v13 = vld [vmem:[%s161_s1] sm:$0x3]  ;;  %94 = vmatpush.msra.mxu1 %v48_v15  ;;  %v50_v18 = vld [vmem:[%s616_s3 + $0x8] sm:$0xff]  ;;  %s156_s25 = scalar_lea.vmem %s621_s8, %s310_s21 }
   0x7   : > { %190 = vmatpush.msra.mxu2 %v168_v9  ;;  %v46_v19 = vld [vmem:[%s615_s2 + $0x8] sm:$0xff]  ;;  %72 = vmatpush.msra.mxu0 %v51_v16  ;;  %v49_v20 = vld [vmem:[%s616_s3] sm:$0xff]  ;;  %v421_v9 = vmov 0  }
   0x8   : > { %213 = vmatpush.msra.mxu3 %v164_v10  ;;  %95 = vmatpush.msra.mxu1 %v47_v17  ;;  %v45_v21 = vld [vmem:[%s615_s2] sm:$0xff]  ;;  %v144_v10 = vstv %s417_s11  ;;  %s37_s11 = sadd.s32 1, %s417_s11  }
   0x9   : > { %191 = vmatpush.msra.mxu2 %v167_v11  ;;  %73 = vmatpush.msra.mxu0 %v50_v18  ;;  %v44_v22 = vld [vmem:[%s43_s13] sm:$0x3]  ;;  %vm145_vm9 = vcmp.lt.s32.totalorder %v144_v10, %v475_v0  ;;  %v261_v18 = vstv %s159_s28  ;;  %p34_p0 = scmp.ge.s32.totalorder %s37_s11, 16  }
   0xa   : > { %214 = vmatpush.msra.mxu3 %v163_v12  ;;  %96 = vmatpush.msra.mxu1 %v46_v19  ;;  %v362_v26 = vld [vmem:[%s617_s4] ss:$0 sm:$0xff]  ;;  %v146_v11 = vsel %vm145_vm9, 1, %v421_v9  ;;  %vm262_vm10 = vcmp.lt.s32.totalorder %v261_v18, %v475_v0 }
   0xb   : > { %54 = vrot.lane.b32.xlu0 %v413_v4, %s419_s19  ;;  %315 = vmatmul.msk.f32.vlgmr.msra.gmra.mxu3 %vm56_vm0, %v162_v13  ;;  %v361_v33 = vld [vmem:[%s620_s7] ss:$0 sm:$0xff]  ;;  %v263_v19 = vsel %vm262_vm10, 1, %v421_v9 }
   0xc   : > { %74 = vmatpush.msra.mxu0 %v49_v20  ;;  %97 = vmatpush.msra.mxu1 %v45_v21 }
   0xd   : > { %312 = vmatmul.msk.f32.vlgmr.msra.gmra.mxu1 %vm56_vm0, %v44_v22  ;;  %360 = vset.pattern.permute.xlu0 %v421_v9 }
   0xe   : > { %359 = vset.pattern.permute.xlu2 %v421_v9 }
  0x75   : > { %v173_v23 = vpop.permute.xlu0 %172 }
  0x76   : > { %314 = vmatmul.msk.f32.vlgmr.msra.gmra.mxu2 %vm56_vm0, %v173_v23 }
  0x7d   : > { %v55_v24 = vpop.permute.xlu0 %54 }
  0x7e   : > { %311 = vmatmul.msk.f32.vlgmr.msra.gmra.mxu0 %vm56_vm0, %v55_v24 }
  0x8a   : > { %v99_v25 = vpop.f32.mrf.mxu1 }
  0x8e   : > { %v216_v30 = vpop.f32.mrf.mxu3 }
  0xf9   : > { %v193_v29 = vpop.f32.mrf.mxu2 }
  0xfa   : > { %v217_v32 = vadd.f32 %v216_v30, %v193_v29 }
  0xfb   : > { %v76_v27 = vpop.f32.mrf.mxu0 }
  0xfc   : > { %v100_v28 = vadd.f32 %v99_v25, %v76_v27  ;;  %v223_v34 = vadd.f32 %v361_v33, %v217_v32 }
  0xfe   : > { %v106_v31 = vadd.f32 %v362_v26, %v100_v28  ;;  %v224_v39 = vsub.f32 0.0, %v223_v34 }
 0x100   : > { %363 = vtanh.f32 %v106_v31  ;;  %v107_v37 = vsub.f32 0.0, %v106_v31  ;;  %v225_v40 = vmul.f32 1.442695, %v224_v39 }
 0x101   : > { %365 = vtanh.f32 %v223_v34 }
 0x102   : > { %v108_v38 = vmul.f32 1.442695, %v107_v37 }
 0x104   : > { %367 = vpow2.f32 %v108_v38 }
 0x105   : > { %369 = vpow2.f32 %v225_v40 }
 0x106   : > { %v364_v35 = vpop.eup %363 }
 0x107   : > { %129 = vrot.lane.b32.xlu1 %v364_v35, %s420_s18  ;;  %v366_v36 = vpop.eup %365 }
 0x10a   : > { %v368_v41 = vpop.eup %367 }
 0x10b   : > { %v110_v42 = vadd.f32 1.0, %v368_v41  ;;  %v370_v43 = vpop.eup %369 }
 0x10c   : > { %v227_v44 = vadd.f32 1.0, %v370_v43 }
 0x10d   : > { %371 = vrcp.f32 %v110_v42  ;;  %v122_v53 = vand.u32 2147483648, %v110_v42  ;;  %vm116_vm2 = vweird.f32 %v110_v42  ;;  %v120_v54 = vand.u32 2147483647, %v110_v42 }
 0x10e   : > { %373 = vrcp.f32 %v227_v44  ;;  %v239_v62 = vand.u32 2147483648, %v227_v44  ;;  %vm233_vm6 = vweird.f32 %v227_v44  ;;  %v237_v63 = vand.u32 2147483647, %v227_v44 }
 0x10f   : > { %246 = vrot.lane.b32.xlu1 %v366_v36, %s420_s18  ;;  %v123_v57 = vor.u32 1.1754944e-38, %v122_v53  ;;  %vm121_vm4 = vcmp.eq.f32.partialorder %v120_v54, 8.507059e+37 }
 0x110   : > { %v240_v5 = vor.u32 1.1754944e-38, %v239_v62  ;;  %vm238_vm8 = vcmp.eq.f32.partialorder %v237_v63, 8.507059e+37 }
 0x113   : > { %v372_v45 = vpop.eup %371 }
 0x114   : > { %v112_v46 = vmul.f32 %v372_v45, %v110_v42  ;;  %v374_v48 = vpop.eup %373  ;;  %vm117_vm1 = vweird.f32 %v372_v45 }
 0x115   : > { %v229_v50 = vmul.f32 %v374_v48, %v227_v44  ;;  %vm118_vm3 = vmor %vm116_vm2, %vm117_vm1  ;;  %vm234_vm5 = vweird.f32 %v374_v48 }
 0x116   : > { %v113_v47 = vsub.f32 1.0, %v112_v46  ;;  %vm235_vm7 = vmor %vm233_vm6, %vm234_vm5 }
 0x117   : > { %v230_v52 = vsub.f32 1.0, %v229_v50 }
 0x118   : > { %v114_v49 = vmul.f32 %v372_v45, %v113_v47 }
 0x119   : > { %v231_v56 = vmul.f32 %v374_v48, %v230_v52 }
 0x11a   : > { %v115_v51 = vadd.f32 %v372_v45, %v114_v49 }
 0x11b   : > { %v232_v61 = vadd.f32 %v374_v48, %v231_v56 }
 0x11c   : > { %v119_v55 = vsel %vm118_vm3, %v372_v45, %v115_v51 }
 0x11d   : > { %v124_v59 = vsel %vm121_vm4, %v123_v57, %v119_v55  ;;  %v236_v4 = vsel %vm235_vm7, %v374_v48, %v232_v61 }
 0x11e   : > { %v241_v6 = vsel %vm238_vm8, %v240_v5, %v236_v4  ;;  %v127_v12 = vmul.f32 %v409_v3, %v124_v59 }
 0x11f   : > { %v244_v14 = vmul.f32 %v401_v1, %v241_v6 }
 0x179   : > { %v130_v58 = vpop.permute.xlu1 %129 }
 0x17a   : > { %v132_v60 = vmul.f32 %v130_v58, %v124_v59 }
 0x17c   : > { %134 = vrot.lane.b32.xlu2 %v132_v60, %s419_s19 }
 0x181   : > { %v247_v7 = vpop.permute.xlu1 %246 }
 0x182   : > { %v249_v8 = vmul.f32 %v247_v7, %v241_v6 }
 0x184   : > { %251 = vrot.lane.b32.xlu2 %v249_v8, %s419_s19 }
 0x18c   : > { %148 = vperm.xlu2 %359, %v146_v11  }
 0x1d6   : > { %v135_v13 = vpop.permute.xlu2 %134 }
 0x1d7   : > { %v137_v3 = vadd.f32 %v135_v13, %v127_v12  }
 0x1d9   : > { %375 = vtanh.f32 %v137_v3 }
 0x1de   : > { %v252_v15 = vpop.permute.xlu2 %251 }
 0x1df   : > { %v376_v16 = vpop.eup %375  ;;  %v254_v17 = vadd.f32 %v252_v15, %v244_v14 }
 0x1e0   : > { %140 = vrot.lane.b32.xlu0 %v376_v16, %s420_s18 }
 0x1e1   : > { %377 = vtanh.f32 %v254_v17 }
 0x1e6   : > { %v149_v21 = vpop.permute.xlu2 %148 }
 0x1e7   : > { %v378_v20 = vpop.eup %377  ;;  %vm150_vm11 = vcmp.eq.s32.totalorder %v149_v21, 1 }
 0x1e8   : > { %265 = vperm.xlu0 %360, %v263_v19   ;;  %257 = vrot.lane.b32.xlu1 %v378_v20, %s420_s18 }
 0x252   : > { %v141_v22 = vpop.permute.xlu0 %140 }
 0x253   : > { %v143_v4 = vmul.f32 %v141_v22, %v124_v59  }
 0x255   : > { %v151_v23 = vsel %vm150_vm11, %v143_v4, 0.0 }
 0x256   : > { %153 = vrot.lane.b32.xlu1 %v151_v23, %s419_s19 }
 0x25a   : > { %v266_v24 = vpop.permute.xlu0 %265  ;;  %v258_v25 = vpop.permute.xlu1 %257 }
 0x25b   : > { %vm267_vm12 = vcmp.eq.s32.totalorder %v266_v24, 1  ;;  %v260_v26 = vmul.f32 %v258_v25, %v241_v6 }
 0x25c   : > { %v269_v1 = vsel %vm267_vm12, %v254_v17, %v401_v1  }
 0x25d   : > { %v268_v2 = vsel %vm267_vm12, %v260_v26, %v405_v2   ;;  %v270_v27 = vsel %vm267_vm12, %v260_v26, 0.0 }
 0x25e   : > { %272 = vrot.lane.b32.xlu2 %v270_v27, %s419_s19 }
 0x2b8   : > { %v273_v28 = vpop.permute.xlu2 %272 }
 0x2b9   : > { %276 = vst.msk [vmem:[%s275_s22] sm:$0x3] %vm157_vm13, %v273_v28 }
 0x2c5   :  { %36 = sbr.rel (!%p34_p0) target bundleno = 2 (0x2), region = 71 }
 0x2c8   : > { %v154_v29 = vpop.permute.xlu1 %153 }
 0x2c9   : > { %158 = vst.msk [vmem:[%s156_s25] sm:$0x3] %vm157_vm13, %v154_v29 }

// kernel: nar_taco_encoder_forward.2
= control target key start
LH: loop header
LB: loop body
LE: loop exit
PB: predicated region body
PF: predicated region fallthrough
CT: control target
= control target key end

     0   :  { %v668_v1 = vmov 0   ;;  %s669_s29 = smov 127   ;;  %s670_s30 = smov 1   ;;  %v49_v3 = vlaneseq  ;;  %vm671_vm4 = vmmov 1   ;;  %vm101_vm8 = vcmask 1039360   ;;  %s965_s0 = inlined_call_operand.vmem [shape: bf16[16,128], index: 0, kind: input, shape index: {}]   ;;  %s966_s2 = inlined_call_operand.vmem [shape: f32[32,1], index: 2, kind: input, shape index: {}]   ;;  %s967_s3 = inlined_call_operand.vmem [shape: f32[32,1], index: 3, kind: input, shape index: {}]   ;;  %s968_s4 = inlined_call_operand.vmem [shape: f32[32,1], index: 4, kind: input, shape index: {}]   ;;  %s969_s1 = inlined_call_operand.vmem [shape: bf16[32,48], index: 1, kind: input, shape index: {}]   ;;  %s970_s6 = inlined_call_operand.vmem [shape: f32[32,1], index: 6, kind: input, shape index: {}]   ;;  %s971_s8 = inlined_call_operand.vmem [shape: f32[32,1], index: 8, kind: input, shape index: {}]   ;;  %s972_s7 = inlined_call_operand.vmem [shape: f32[32,1], index: 7, kind: input, shape index: {}]   ;;  %s973_s5 = inlined_call_operand.vmem [shape: bf16[32,96], index: 5, kind: input, shape index: {}]   ;;  %s974_s10 = inlined_call_operand.vmem [shape: f32[32,1], index: 10, kind: input, shape index: {}]   ;;  %s975_s11 = inlined_call_operand.vmem [shape: f32[32,1], index: 11, kind: input, shape index: {}]   ;;  %s976_s12 = inlined_call_operand.vmem [shape: f32[32,1], index: 12, kind: input, shape index: {}]   ;;  %s977_s9 = inlined_call_operand.vmem [shape: bf16[32,96], index: 9, kind: input, shape index: {}]   ;;  %s978_s13 = inlined_call_operand.vmem [shape: f32[32,128], index: 13, kind: output, shape index: {}]  }
   0x1   :  { %v648_v0 = vld [vmem:[%s965_s0] sm:$0xff]  ;;  %665 = vset.pattern.permute.xlu1 %v668_v1  ;;  %v133_v2 = vld [vmem:[%s966_s2 + $0x10] sm:$0xff]  ;;  %666 = vset.pattern.permute.xlu2 %v668_v1  ;;  %v134_v4 = vld [vmem:[%s966_s2 + $0x18] sm:$0xff]  ;;  %v85_v14 = vunpack.c.l.b16 %v668_v1  ;;  %v86_v17 = vunpack.c.h.b16 %v668_v1  ;;  %vm70_vm12 = vcmask 7168   ;;  %vm165_vm14 = vcmask 392192  }
   0x2   :  { %147 = vperm.xlu1 %665, %v133_v2   ;;  %667 = vset.pattern.permute.xlu0 %v668_v1  ;;  %v50_v5 = vand.u32 127, %v49_v3  ;;  %v198_v7 = vld [vmem:[%s967_s3 + $0x18] sm:$0xff]  ;;  %v131_v8 = vld [vmem:[%s966_s2] sm:$0xff]  ;;  %v197_v10 = vld [vmem:[%s967_s3 + $0x10] sm:$0xff]  ;;  %vm343_vm15 = vcmask 785408  }
   0x3   :  { %99 = vrot.lane.b32.xlu0 %v648_v0, %s669_s29  ;;  %v226_v9 = vld [vmem:[%s968_s4 + $0x18] sm:$0xff]  ;;  %137 = vperm.xlu2 %666, %v131_v8   ;;  %v132_v13 = vld [vmem:[%s966_s2 + $0x8] sm:$0xff]  ;;  %v223_v16 = vld [vmem:[%s968_s4] sm:$0xff] }
   0x4   :  { %v55_v6 = vand.u32 15, %v50_v5  ;;  %v47_v19 = vld [vmem:[%s965_s0] sm:$0xf]  ;;  %v48_v20 = vld [vmem:[%s965_s0 + $0x4] sm:$0xf]  ;;  %vm777_vm5 = vmpackc.low %vm671_vm4, %vm671_vm4 }
   0x5   :  { %v97_v23 = vsel %vm777_vm5, %v47_v19, 0  ;;  %v98_v24 = vsel %vm777_vm5, %v48_v20, 0  ;;  %v225_v26 = vld [vmem:[%s968_s4 + $0x10] sm:$0xff]  ;;  %v196_v27 = vld [vmem:[%s967_s3 + $0x8] sm:$0xff]  ;;  %v195_v37 = vld [vmem:[%s967_s3] sm:$0xff] }
   0x6   :  { %vm106_vm0 = vcmp.lt.s32.totalorder %v55_v6, 15  ;;  %vm75_vm2 = vcmp.ge.s32.totalorder %v55_v6, 1  ;;  %v123_v29 = vunpack.c.l.b16 %v97_v23  ;;  %v124_v30 = vunpack.c.l.b16 %v98_v24  ;;  %v649_v42 = vld [vmem:[%s969_s1] sm:$0xff]  ;;  %v224_v43 = vld [vmem:[%s968_s4 + $0x8] sm:$0xff]  ;;  %v490_v21 = vld [vmem:[%s974_s10 + $0x18] sm:$0xff] }
   0x7   :  { %vm110_vm1 = vmpackc.low %vm106_vm0, %vm106_vm0  ;;  %v650_v44 = vld [vmem:[%s969_s1 + $0x8] sm:$0xff]  ;;  %v653_v28 = vld [vmem:[%s977_s9] sm:$0xff] }
   0x8   :  { %v111_v11 = vsel %vm110_vm1, 65537, %v668_v1  ;;  %vm80_vm3 = vmpackc.low %vm75_vm2, %vm75_vm2  ;;  %v125_v36 = vpack.c.b16 %v124_v30, %v123_v29 }
   0x9   :  { %v112_v12 = vperm.slane %v111_v11, 0  ;;  %v81_v22 = vsel %vm80_vm3, 65537, %v668_v1 }
   0xa   :  { %152 = vperm.xlu1 %665, %v134_v4   ;;  %v82_v25 = vperm.slane %v81_v22, 0  ;;  %v311_v22 = vld [vmem:[%s970_s6 + $0x10] sm:$0xff] }
   0xb   :  { %68 = vrot.lane.b32.xlu0 %v648_v0, %s670_s30  ;;  %v113_v15 = vunpack.c.l.b16 %v112_v12  ;;  %142 = vperm.xlu2 %666, %v132_v13   ;;  %v114_v18 = vunpack.c.h.b16 %v112_v12 }
   0xc   :  { %v83_v32 = vunpack.c.l.b16 %v82_v25  ;;  %v84_v33 = vunpack.c.h.b16 %v82_v25 }
   0xd   :  { %vm117_vm6 = vcmp.ne.s32.totalorder %v113_v15, %v85_v14  ;;  %vm118_vm7 = vcmp.ne.s32.totalorder %v114_v18, %v86_v17 }
   0xe   :  { %vm791_vm9 = vmpackc.low %vm118_vm7, %vm117_vm6  ;;  %vm87_vm10 = vcmp.ne.s32.totalorder %v83_v32, %v85_v14  ;;  %vm88_vm11 = vcmp.ne.s32.totalorder %v84_v33, %v86_v17 }
   0xf   :  { %vm801_vm13 = vmpackc.low %vm88_vm11, %vm87_vm10 }
  0x12   :  { %216 = vperm.xlu1 %665, %v198_v7  }
  0x13   :  { %211 = vperm.xlu0 %667, %v197_v10   ;;  %239 = vperm.xlu2 %666, %v225_v26  }
  0x1a   :  { %244 = vperm.xlu1 %665, %v226_v9  }
  0x1b   :  { %206 = vperm.xlu0 %667, %v196_v27   ;;  %201 = vperm.xlu2 %666, %v195_v37   ;;  %v312_v37 = vld [vmem:[%s970_s6 + $0x18] sm:$0xff] }
  0x22   :  { %229 = vperm.xlu1 %665, %v223_v16  }
  0x23   :  { %234 = vperm.xlu2 %666, %v224_v43   ;;  %v404_v43 = vld [vmem:[%s971_s8 + $0x18] sm:$0xff] }
  0x5d   :  { %v138_v46 = vpop.permute.xlu2 %137 }
  0x65   :  { %v143_v48 = vpop.permute.xlu2 %142 }
  0x6d   :  { %v240_v50 = vpop.permute.xlu2 %239 }
  0x74   :  { %v148_v45 = vpop.permute.xlu1 %147 }
  0x75   :  { %v100_v31 = vpop.permute.xlu0 %99  ;;  %v202_v56 = vpop.permute.xlu2 %201 }
  0x76   :  { %v103_v34 = vsel %vm101_vm8, %v100_v31, 0 }
  0x77   :  { %v120_v35 = vsel %vm791_vm9, %v103_v34, 0 }
  0x78   :  { %177 = vmatpush.bf16.msra.mxu0 %v120_v35  ;;  %v310_v35 = vld [vmem:[%s970_s6 + $0x8] sm:$0xff] }
  0x7c   :  { %178 = vmatpush.bf16.msra.mxu0 %v125_v36  ;;  %v153_v47 = vpop.permute.xlu1 %152 }
  0x7d   :  { %v69_v39 = vpop.permute.xlu0 %68  ;;  %v235_v2 = vpop.permute.xlu2 %234 }
  0x7e   :  { %v73_v40 = vsel %vm70_vm12, 0, %v69_v39  ;;  %v403_v39 = vld [vmem:[%s971_s8 + $0x10] sm:$0xff] }
  0x7f   :  { %v90_v41 = vsel %vm801_vm13, %v73_v40, 0  ;;  %v375_v40 = vld [vmem:[%s972_s7 + $0x10] sm:$0xff] }
  0x80   :  { %179 = vmatpush.bf16.msra.mxu0 %v90_v41  ;;  %v309_v41 = vld [vmem:[%s970_s6] sm:$0xff] }
  0x83   :  { %626 = vmatmul.msk.bf16.vlgmr.msra.gmra.mxu0 %vm165_vm14, %v649_v42  ;;  %v374_v42 = vld [vmem:[%s972_s7 + $0x8] sm:$0xff] }
  0x84   :  { %v217_v49 = vpop.permute.xlu1 %216 }
  0x85   :  { %v212_v53 = vpop.permute.xlu0 %211 }
  0x8c   :  { %v245_v51 = vpop.permute.xlu1 %244 }
  0x8d   :  { %v207_v62 = vpop.permute.xlu0 %206 }
  0x93   :  { %627 = vmatmul.msk.bf16.gmra.mxu0 %vm165_vm14, %v650_v44  ;;  %v376_v44 = vld [vmem:[%s972_s7 + $0x18] sm:$0xff] }
  0x94   :  { %v230_v58 = vpop.permute.xlu1 %229 }
 0x100   :  { %v181_v52 = vpop.f32.mrf.mxu0 }
 0x101   :  { %v182_v54 = vadd.f32 %v181_v52, %v138_v46  ;;  %v373_v46 = vld [vmem:[%s972_s7] sm:$0xff] }
 0x103   :  { %v191_v55 = vmax.f32 %v182_v54, 0.0 }
 0x105   :  { %v219_v57 = vmul.f32 %v202_v56, %v191_v55 }
 0x107   :  { %v247_v60 = vadd.f32 %v230_v58, %v219_v57 }
 0x108   :  { %v183_v59 = vpop.f32.mrf.mxu0 }
 0x109   :  { %v184_v61 = vadd.f32 %v183_v59, %v143_v48  ;;  %v251_v0 = vpack.c.bf16 %v247_v60, %v247_v60  ;;  %v651_v60 = vld [vmem:[%s973_s5] sm:$0xff] }
 0x10b   :  { %v192_v63 = vmax.f32 %v184_v61, 0.0  ;;  %v277_v5 = vsel %vm777_vm5, %v251_v0, 0  ;;  %v259_v8 = vunpack.c.l.b16 %v251_v0  ;;  %v652_v61 = vld [vmem:[%s973_s5 + $0x8] sm:$0xff] }
 0x10c   :  { %v297_v12 = vunpack.c.l.b16 %v277_v5 }
 0x10d   :  { %v220_v1 = vmul.f32 %v207_v62, %v192_v63 }
 0x10f   :  { %v248_v3 = vadd.f32 %v235_v2, %v220_v1 }
 0x110   :  { %v186_v4 = vpop.f32.mrf.mxu0 }
 0x111   :  { %v252_v6 = vpack.c.bf16 %v248_v3, %v248_v3  ;;  %v187_v7 = vadd.f32 %v186_v4, %v148_v45  ;;  %v401_v45 = vld [vmem:[%s971_s8] sm:$0xff] }
 0x113   :  { %v260_v9 = vunpack.c.l.b16 %v252_v6  ;;  %v193_v10 = vmax.f32 %v187_v7, 0.0  ;;  %v278_v11 = vsel %vm777_vm5, %v252_v6, 0 }
 0x114   :  { %v298_v13 = vunpack.c.l.b16 %v278_v11 }
 0x115   :  { %v221_v14 = vmul.f32 %v212_v53, %v193_v10  ;;  %v263_v15 = vpack.c.b16 %v260_v9, %v259_v8 }
 0x116   :  { %v301_v16 = vpack.c.b16 %v298_v13, %v297_v12 }
 0x117   :  { %281 = vrot.lane.b32.xlu1 %v263_v15, %s669_s29  ;;  %v249_v18 = vadd.f32 %v240_v50, %v221_v14 }
 0x118   :  { %v188_v17 = vpop.f32.mrf.mxu0 }
 0x119   :  { %v189_v19 = vadd.f32 %v188_v17, %v153_v47  ;;  %v253_v23 = vpack.c.bf16 %v249_v18, %v249_v18  ;;  %v402_v47 = vld [vmem:[%s971_s8 + $0x8] sm:$0xff] }
 0x11b   :  { %v194_v20 = vmax.f32 %v189_v19, 0.0  ;;  %v279_v27 = vsel %vm777_vm5, %v253_v23, 0  ;;  %v261_v29 = vunpack.c.l.b16 %v253_v23 }
 0x11c   :  { %v299_v32 = vunpack.c.l.b16 %v279_v27 }
 0x11d   :  { %v222_v24 = vmul.f32 %v217_v49, %v194_v20 }
 0x11f   :  { %v250_v25 = vadd.f32 %v245_v51, %v222_v24  ;;  %325 = vperm.xlu1 %665, %v311_v22  }
 0x121   :  { %v254_v26 = vpack.c.bf16 %v250_v25, %v250_v25 }
 0x123   :  { %v262_v30 = vunpack.c.l.b16 %v254_v26  ;;  %v280_v31 = vsel %vm777_vm5, %v254_v26, 0 }
 0x124   :  { %v300_v33 = vunpack.c.l.b16 %v280_v31 }
 0x125   :  { %v264_v34 = vpack.c.b16 %v262_v30, %v261_v29 }
 0x126   :  { %v302_v36 = vpack.c.b16 %v300_v33, %v299_v32 }
 0x127   :  { %267 = vrot.lane.b32.xlu2 %v264_v34, %s670_s30  ;;  %283 = vrot.lane.b32.xlu0 %v264_v34, %s669_s29 }
 0x128   :  { %320 = vperm.xlu1 %665, %v310_v35  }
 0x12f   :  { %330 = vperm.xlu2 %666, %v312_v37   ;;  %265 = vrot.lane.b32.xlu0 %v263_v15, %s670_s30 }
 0x130   :  { %417 = vperm.xlu1 %665, %v403_v39  }
 0x137   :  { %389 = vperm.xlu2 %666, %v375_v40   ;;  %315 = vperm.xlu0 %667, %v309_v41  }
 0x138   :  { %384 = vperm.xlu1 %665, %v374_v42  }
 0x13f   :  { %422 = vperm.xlu2 %666, %v404_v43   ;;  %394 = vperm.xlu0 %667, %v376_v44  }
 0x147   :  { %407 = vperm.xlu2 %666, %v401_v45   ;;  %379 = vperm.xlu0 %667, %v373_v46  }
 0x14f   :  { %412 = vperm.xlu0 %667, %v402_v47  }
 0x181   :  { %v268_v54 = vpop.permute.xlu2 %267 }
 0x182   :  { %v273_v55 = vsel %vm70_vm12, 0, %v268_v54  ;;  %v488_v54 = vld [vmem:[%s974_s10 + $0x8] sm:$0xff] }
 0x183   :  { %v276_v57 = vsel %vm801_vm13, %v273_v55, 0  ;;  %v550_v55 = vld [vmem:[%s975_s11] sm:$0xff] }
 0x189   :  { %v282_v48 = vpop.permute.xlu1 %281  ;;  %v331_v62 = vpop.permute.xlu2 %330 }
 0x18a   :  { %v286_v52 = vsel %vm101_vm8, %v282_v48, 0 }
 0x18b   :  { %v291_v53 = vsel %vm791_vm9, %v286_v52, 0  ;;  %v487_v52 = vld [vmem:[%s974_s10] sm:$0xff] }
 0x191   :  { %v326_v63 = vpop.permute.xlu1 %325  ;;  %v390_v1 = vpop.permute.xlu2 %389 }
 0x199   :  { %v284_v49 = vpop.permute.xlu0 %283  ;;  %v423_v4 = vpop.permute.xlu2 %422 }
 0x19a   :  { %v289_v50 = vsel %vm101_vm8, %v284_v49, 0  ;;  %v321_v2 = vpop.permute.xlu1 %320 }
 0x19b   :  { %v292_v51 = vsel %vm791_vm9, %v289_v50, 0 }
 0x19c   :  { %352 = vmatpush.bf16.msra.mxu1 %v292_v51  ;;  %655 = vmatpush.bf16.msra.mxu3 %v292_v51 }
 0x1a0   :  { %353 = vmatpush.bf16.msra.mxu1 %v291_v53  ;;  %656 = vmatpush.bf16.msra.mxu3 %v291_v53 }
 0x1a1   :  { %v266_v56 = vpop.permute.xlu0 %265  ;;  %v408_v13 = vpop.permute.xlu2 %407 }
 0x1a2   :  { %v270_v58 = vsel %vm70_vm12, 0, %v266_v56  ;;  %v418_v7 = vpop.permute.xlu1 %417  ;;  %v489_v56 = vld [vmem:[%s974_s10 + $0x10] sm:$0xff] }
 0x1a3   :  { %v275_v59 = vsel %vm801_vm13, %v270_v58, 0  ;;  %v553_v58 = vld [vmem:[%s975_s11 + $0x18] sm:$0xff] }
 0x1a4   :  { %354 = vmatpush.bf16.msra.mxu1 %v302_v36  ;;  %657 = vmatpush.bf16.msra.mxu3 %v302_v36 }
 0x1a8   :  { %355 = vmatpush.bf16.msra.mxu1 %v301_v16  ;;  %658 = vmatpush.bf16.msra.mxu3 %v301_v16 }
 0x1a9   :  { %v316_v0 = vpop.permute.xlu0 %315 }
 0x1aa   :  { %v385_v20 = vpop.permute.xlu1 %384 }
 0x1ac   :  { %356 = vmatpush.bf16.msra.mxu1 %v276_v57  ;;  %659 = vmatpush.bf16.msra.mxu3 %v276_v57  ;;  %v552_v57 = vld [vmem:[%s975_s11 + $0x10] sm:$0xff] }
 0x1b0   :  { %357 = vmatpush.bf16.msra.mxu1 %v275_v59  ;;  %660 = vmatpush.bf16.msra.mxu3 %v275_v59  ;;  %v551_v59 = vld [vmem:[%s975_s11 + $0x8] sm:$0xff] }
 0x1b1   :  { %v395_v3 = vpop.permute.xlu0 %394 }
 0x1b3   :  { %636 = vmatmul.msk.bf16.vlgmr.msra.gmra.mxu1 %vm343_vm15, %v651_v60  ;;  %637 = vmatmul.msk.bf16.vlgmr.msra.gmra.mxu3 %vm343_vm15, %v652_v61  ;;  %v579_v60 = vld [vmem:[%s976_s12 + $0x8] sm:$0xff]  ;;  %v580_v61 = vld [vmem:[%s976_s12 + $0x10] sm:$0xff] }
 0x1b9   :  { %v380_v9 = vpop.permute.xlu0 %379 }
 0x1c1   :  { %v413_v24 = vpop.permute.xlu0 %412 }
 0x230   :  { %v359_v5 = vpop.f32.mrf.mxu1 }
 0x231   :  { %v360_v6 = vadd.f32 %v359_v5, %v316_v0 }
 0x233   :  { %v369_v8 = vmax.f32 %v360_v6, 0.0 }
 0x235   :  { %v397_v10 = vmul.f32 %v380_v9, %v369_v8 }
 0x236   :  { %v364_v11 = vpop.f32.mrf.mxu3 }
 0x237   :  { %v365_v12 = vadd.f32 %v364_v11, %v326_v63  ;;  %v425_v15 = vadd.f32 %v408_v13, %v397_v10  ;;  %v581_v63 = vld [vmem:[%s976_s12 + $0x18] sm:$0xff] }
 0x238   :  { %v361_v14 = vpop.f32.mrf.mxu1 }
 0x239   :  { %v371_v16 = vmax.f32 %v365_v12, 0.0  ;;  %v362_v17 = vadd.f32 %v361_v14, %v321_v2  ;;  %v429_v22 = vpack.c.bf16 %v425_v15, %v425_v15  ;;  %v654_v12 = vld [vmem:[%s977_s9 + $0x8] sm:$0xff] }
 0x23b   :  { %v399_v18 = vmul.f32 %v390_v1, %v371_v16  ;;  %v370_v19 = vmax.f32 %v362_v17, 0.0  ;;  %v455_v32 = vsel %vm777_vm5, %v429_v22, 0  ;;  %v437_v33 = vunpack.c.l.b16 %v429_v22 }
 0x23c   :  { %v475_v39 = vunpack.c.l.b16 %v455_v32 }
 0x23d   :  { %v398_v23 = vmul.f32 %v385_v20, %v370_v19  ;;  %v427_v26 = vadd.f32 %v418_v7, %v399_v18 }
 0x23e   :  { %v366_v25 = vpop.f32.mrf.mxu3 }
 0x23f   :  { %v426_v27 = vadd.f32 %v413_v24, %v398_v23  ;;  %v367_v29 = vadd.f32 %v366_v25, %v331_v62  ;;  %v431_v34 = vpack.c.bf16 %v427_v26, %v427_v26  ;;  %v578_v62 = vld [vmem:[%s976_s12] sm:$0xff] }
 0x241   :  { %v430_v30 = vpack.c.bf16 %v426_v27, %v426_v27  ;;  %v372_v31 = vmax.f32 %v367_v29, 0.0  ;;  %v457_v45 = vsel %vm777_vm5, %v431_v34, 0  ;;  %v439_v46 = vunpack.c.l.b16 %v431_v34 }
 0x242   :  { %v477_v49 = vunpack.c.l.b16 %v457_v45 }
 0x243   :  { %v400_v35 = vmul.f32 %v395_v3, %v372_v31  ;;  %v438_v36 = vunpack.c.l.b16 %v430_v30  ;;  %v456_v37 = vsel %vm777_vm5, %v430_v30, 0 }
 0x244   :  { %v476_v40 = vunpack.c.l.b16 %v456_v37 }
 0x245   :  { %v428_v41 = vadd.f32 %v423_v4, %v400_v35  ;;  %v441_v42 = vpack.c.b16 %v438_v36, %v437_v33 }
 0x246   :  { %v479_v43 = vpack.c.b16 %v476_v40, %v475_v39 }
 0x247   :  { %v432_v44 = vpack.c.bf16 %v428_v41, %v428_v41  ;;  %459 = vrot.lane.b32.xlu2 %v441_v42, %s669_s29 }
 0x249   :  { %v440_v47 = vunpack.c.l.b16 %v432_v44  ;;  %v458_v48 = vsel %vm777_vm5, %v432_v44, 0 }
 0x24a   :  { %v478_v50 = vunpack.c.l.b16 %v458_v48 }
 0x24b   :  { %v442_v51 = vpack.c.b16 %v440_v47, %v439_v46 }
 0x24c   :  { %v480_v53 = vpack.c.b16 %v478_v50, %v477_v49 }
 0x24d   :  { %445 = vrot.lane.b32.xlu0 %v442_v51, %s670_s30  ;;  %461 = vrot.lane.b32.xlu1 %v442_v51, %s669_s29 }
 0x24f   :  { %493 = vperm.xlu2 %666, %v487_v52  }
 0x255   :  { %498 = vperm.xlu0 %667, %v488_v54   ;;  %443 = vrot.lane.b32.xlu1 %v441_v42, %s670_s30 }
 0x257   :  { %508 = vperm.xlu2 %666, %v490_v21  }
 0x25d   :  { %556 = vperm.xlu0 %667, %v550_v55   ;;  %503 = vperm.xlu1 %665, %v489_v56  }
 0x25f   :  { %566 = vperm.xlu2 %666, %v552_v57  }
 0x265   :  { %571 = vperm.xlu0 %667, %v553_v58   ;;  %561 = vperm.xlu1 %665, %v551_v59  }
 0x267   :  { %589 = vperm.xlu2 %666, %v579_v60  }
 0x26d   :  { %594 = vperm.xlu0 %667, %v580_v61   ;;  %584 = vperm.xlu1 %665, %v578_v62  }
 0x275   :  { %599 = vperm.xlu1 %665, %v581_v63  }
 0x2a1   :  { %v460_v0 = vpop.permute.xlu2 %459 }
 0x2a2   :  { %v464_v4 = vsel %vm101_vm8, %v460_v0, 0 }
 0x2a3   :  { %v469_v5 = vsel %vm791_vm9, %v464_v4, 0 }
 0x2a9   :  { %v494_v13 = vpop.permute.xlu2 %493 }
 0x2b1   :  { %v509_v16 = vpop.permute.xlu2 %508 }
 0x2b9   :  { %v567_v22 = vpop.permute.xlu2 %566 }
 0x2bf   :  { %v462_v1 = vpop.permute.xlu1 %461  ;;  %v446_v6 = vpop.permute.xlu0 %445 }
 0x2c0   :  { %v467_v2 = vsel %vm101_vm8, %v462_v1, 0  ;;  %v451_v7 = vsel %vm70_vm12, 0, %v446_v6 }
 0x2c1   :  { %v470_v3 = vsel %vm791_vm9, %v467_v2, 0  ;;  %v454_v9 = vsel %vm801_vm13, %v451_v7, 0  ;;  %v590_v32 = vpop.permute.xlu2 %589 }
 0x2c2   :  { %529 = vmatpush.bf16.msra.mxu2 %v470_v3 }
 0x2c6   :  { %530 = vmatpush.bf16.msra.mxu2 %v469_v5 }
 0x2c7   :  { %v444_v8 = vpop.permute.xlu1 %443  ;;  %v499_v15 = vpop.permute.xlu0 %498 }
 0x2c8   :  { %v448_v10 = vsel %vm70_vm12, 0, %v444_v8 }
 0x2c9   :  { %v453_v11 = vsel %vm801_vm13, %v448_v10, 0 }
 0x2ca   :  { %531 = vmatpush.bf16.msra.mxu2 %v480_v53 }
 0x2ce   :  { %532 = vmatpush.bf16.msra.mxu2 %v479_v43 }
 0x2cf   :  { %v504_v14 = vpop.permute.xlu1 %503  ;;  %v557_v19 = vpop.permute.xlu0 %556 }
 0x2d2   :  { %533 = vmatpush.bf16.msra.mxu2 %v454_v9 }
 0x2d6   :  { %534 = vmatpush.bf16.msra.mxu2 %v453_v11 }
 0x2d7   :  { %v562_v17 = vpop.permute.xlu1 %561  ;;  %v572_v30 = vpop.permute.xlu0 %571 }
 0x2d9   :  { %646 = vmatmul.msk.bf16.vlgmr.msra.gmra.mxu2 %vm343_vm15, %v653_v28 }
 0x2df   :  { %v585_v24 = vpop.permute.xlu1 %584  ;;  %v595_v39 = vpop.permute.xlu0 %594 }
 0x2e7   :  { %v600_v45 = vpop.permute.xlu1 %599 }
 0x2e9   :  { %647 = vmatmul.msk.bf16.gmra.mxu2 %vm343_vm15, %v654_v12 }
 0x35c   :  { %v536_v38 = vpop.f32.mrf.mxu2 }
 0x35d   :  { %v537_v18 = vadd.f32 %v536_v38, %v494_v13 }
 0x35f   :  { %v546_v20 = vmax.f32 %v537_v18, 0.0 }
 0x361   :  { %v574_v23 = vmul.f32 %v557_v19, %v546_v20 }
 0x363   :  { %v602_v25 = vadd.f32 %v585_v24, %v574_v23 }
 0x364   :  { %v538_v26 = vpop.f32.mrf.mxu2 }
 0x365   :  { %606 = vst [vmem:[%s978_s13] sm:$0xff] %v602_v25  ;;  %v539_v27 = vadd.f32 %v538_v26, %v499_v15 }
 0x367   :  { %v547_v29 = vmax.f32 %v539_v27, 0.0 }
 0x369   :  { %v575_v31 = vmul.f32 %v562_v17, %v547_v29 }
 0x36b   :  { %v603_v33 = vadd.f32 %v590_v32, %v575_v31 }
 0x36c   :  { %v541_v34 = vpop.f32.mrf.mxu2 }
 0x36d   :  { %607 = vst [vmem:[%s978_s13 + $0x8] sm:$0xff] %v603_v33  ;;  %v542_v35 = vadd.f32 %v541_v34, %v504_v14 }
 0x36f   :  { %v548_v36 = vmax.f32 %v542_v35, 0.0 }
 0x371   :  { %v576_v37 = vmul.f32 %v567_v22, %v548_v36 }
 0x373   :  { %v604_v40 = vadd.f32 %v595_v39, %v576_v37 }
 0x374   :  { %v543_v41 = vpop.f32.mrf.mxu2 }
 0x375   :  { %608 = vst [vmem:[%s978_s13 + $0x10] sm:$0xff] %v604_v40  ;;  %v544_v42 = vadd.f32 %v543_v41, %v509_v16 }
 0x377   :  { %v549_v43 = vmax.f32 %v544_v42, 0.0 }
 0x379   :  { %v577_v44 = vmul.f32 %v572_v30, %v549_v43 }
 0x37b   :  { %v605_v46 = vadd.f32 %v600_v45, %v577_v44 }
 0x37d   :  { %609 = vst [vmem:[%s978_s13 + $0x18] sm:$0xff] %v605_v46 }

</bundles_post_ra>
